<compile_context>
chip_gen: v7x
topology: tpu7x:2x2x1
jax: 0.10.0
libtpu: 0.0.40
codegen_flags: <defaults>
</compile_context>

<pallas_src>
import jax
import jax.numpy as jnp
from jax.experimental import pallas as pl
from jax.experimental.pallas import tpu as pltpu


def _merge_ln_linear_kernel(x_ref, w_ref, b_ref, o_ref):
    """One grid step.

    x_ref: (tbh, 2, W2, 2C)  activation tile; axis 1 = image-row parity,
                             last axis = [even-col C | odd-col C] channels.
    w_ref: (4C, D)   gamma-folded weight, rows in [x0, x2, x1, x3] order
                     (matches concat(even-row half, odd-row half)); native dtype.
    b_ref: (1, D)    f32 bias = beta @ W^T.
    o_ref: (tbh*W2, D) output tile.
    """
    tbh, _, w2, c2 = x_ref.shape
    rows = tbh * w2
    inv_c4 = 1.0 / (2 * c2)  # true LayerNorm width = 4C

    # Split even / odd image rows; flatten (tbh, W2) -> merged-token rows.
    ev = x_ref[:, 0, :, :].reshape(rows, c2).astype(jnp.float32)
    od = x_ref[:, 1, :, :].reshape(rows, c2).astype(jnp.float32)

    # One-pass LayerNorm statistics over the full 4C width (f32 on the VPU).
    s1 = (jnp.sum(ev, axis=-1, keepdims=True)
          + jnp.sum(od, axis=-1, keepdims=True))
    s2 = (jnp.sum(ev * ev, axis=-1, keepdims=True)
          + jnp.sum(od * od, axis=-1, keepdims=True))
    mean = s1 * inv_c4
    var = jnp.maximum(s2 * inv_c4 - mean * mean, 0.0)
    rstd = jax.lax.rsqrt(var + 1e-5)

    # gamma/beta live in w_ref/b_ref, so only center + scale remains here.
    # (A still stronger fold -- rstd*(x@W' - mean*colsum(W')) + bias, feeding
    # the MXU raw bf16 activations -- is possible but tolerance-sensitive.)
    y = (jnp.concatenate([ev, od], axis=-1) - mean) * rstd

    # Single K=4C matmul on the MXU in the weight's native dtype, f32 accum.
    acc = jnp.dot(y.astype(w_ref.dtype), w_ref[...],
                  preferred_element_type=jnp.float32)
    o_ref[...] = (acc + b_ref[...]).astype(o_ref.dtype)


def patch_merging_forward(x, input_resolution, gamma, beta, weight,
                          *, block_rows=512, out_dtype=None):
    """2x2 patch merge -> LayerNorm(4C) -> Linear(4C -> D, no bias).

    x:      (B, H*W, C)
    gamma:  (4C,)   LayerNorm weight
    beta:   (4C,)   LayerNorm bias
    weight: (D, 4C) Linear weight (PyTorch out x in convention)
    returns (B, H*W//4, D)
    """
    H, W = input_resolution
    B, L, C = x.shape
    assert L == H * W, "input feature has wrong size"
    assert H % 2 == 0 and W % 2 == 0, f"x size ({H}*{W}) are not even."
    H2, W2 = H // 2, W // 2
    C2, C4 = 2 * C, 4 * C
    D = weight.shape[0]
    assert weight.shape == (D, C4)
    out_dtype = out_dtype or x.dtype

    BH2 = B * H2
    R = BH2 * W2  # number of merged tokens

    # ---- fold the 2x2 gather: free reshape, no HBM copy ------------------
    # (B, H, W, C) -> (B*H/2, 2, W/2, 2C): axis 1 = image-row parity,
    # last axis packs [even-col C | odd-col C] for one merged token.
    x5 = x.reshape(BH2, 2, W2, C2)

    # ---- fold gamma into the weight and beta into an output bias ---------
    # kernel channel order after concat(even half, odd half) is [x0, x2, x1, x3]
    wt = weight.astype(jnp.float32).T                                  # (4C, D)
    w_perm = jnp.concatenate(
        [wt[0:C], wt[2 * C:3 * C], wt[C:2 * C], wt[3 * C:4 * C]], axis=0)
    g = gamma.astype(jnp.float32)
    g_perm = jnp.concatenate(
        [g[0:C], g[2 * C:3 * C], g[C:2 * C], g[3 * C:4 * C]])
    w_fold = (g_perm[:, None] * w_perm).astype(weight.dtype)   # f32 fold, cast once
    bias = (beta.astype(jnp.float32) @ wt).reshape(1, D)       # (1, D) f32

    # ---- tile sizing: generation-aware VMEM budget, >= ~4 grid steps -----
    try:
        vmem_cap = int(pltpu.get_tpu_info().vmem_capacity_bytes)
    except Exception:
        vmem_cap = 64 * 1024 * 1024            # conservative fallback (v7x-sized)
    vmem_budget = (vmem_cap * 3) // 8          # 24 MiB on v7x, 48 MiB on v5e/v6e

    x_b = jnp.dtype(x.dtype).itemsize
    w_b = jnp.dtype(w_fold.dtype).itemsize
    o_b = jnp.dtype(out_dtype).itemsize

    def _vmem_est(t):
        rows = t * W2
        est = 2 * t * 2 * W2 * C2 * x_b                  # double-buffered input block
        est += 2 * rows * D * o_b                        # double-buffered output block
        est += C4 * D * w_b + 8 * max(D, 128) * 4        # resident weight + bias
        # live kernel temporaries: ev/od + squares (f32), concat y (f32) and its
        # MXU-dtype cast, f32 accumulator.
        est += rows * (3 * C4 * 4 + C4 * w_b + D * 4)
        return est

    if W2 % 8 != 0:
        # Tiny / odd resolutions: a single full block keeps the (8,128) rule
        # trivially satisfied (full-extent sublane dim).  No shrink loop here.
        tbh = BH2
    else:
        tbh = max(1, min(block_rows // W2, BH2))
        tbh = max(1, min(tbh, BH2 // 4))   # >= ~4 grid steps: overlap + megacore
        while tbh > 1 and _vmem_est(tbh) > vmem_budget:
            tbh = max(1, tbh // 2)

    grid = (pl.cdiv(BH2, tbh),)            # clamped/masked tail if not divisible
    vmem_limit = int(min(vmem_cap - (16 << 20),          # leave compiler headroom
                         max(32 << 20, 2 * _vmem_est(tbh))))

    def _run(single_buffer_resident):
        def _res_spec(shape):
            nd = len(shape)
            idx = lambda i: (0,) * nd
            if single_buffer_resident:
                return pl.BlockSpec(shape, idx, pipeline_mode=pl.Buffered(1))
            return pl.BlockSpec(shape, idx)

        return pl.pallas_call(
            _merge_ln_linear_kernel,
            out_shape=jax.ShapeDtypeStruct((R, D), out_dtype),
            grid_spec=pltpu.PrefetchScalarGridSpec(
                num_scalar_prefetch=0,
                grid=grid,
                in_specs=[
                    pl.BlockSpec((tbh, 2, W2, C2), lambda i: (i, 0, 0, 0)),
                    _res_spec((C4, D)),     # gamma-folded weight (resident)
                    _res_spec((1, D)),      # beta-folded bias   (resident, f32)
                ],
                out_specs=pl.BlockSpec((tbh * W2, D), lambda i: (i, 0)),
            ),
            compiler_params=pltpu.CompilerParams(
                dimension_semantics=("parallel",),
                vmem_limit_bytes=vmem_limit,
            ),
        )(x5, w_fold, bias)

    try:
        out2d = _run(True)
    except Exception:
        # pl.Buffered(1) not accepted by this jax build -> default buffering.
        out2d = _run(False)

    return out2d.reshape(B, H2 * W2, D)


def _reference_forward(x, input_resolution, gamma, beta, weight):
    """Pure-JAX (f32) reference matching the PyTorch module semantics."""
    H, W = input_resolution
    B, L, C = x.shape
    xv = x.reshape(B, H, W, C)
    x0 = xv[:, 0::2, 0::2, :]
    x1 = xv[:, 1::2, 0::2, :]
    x2 = xv[:, 0::2, 1::2, :]
    x3 = xv[:, 1::2, 1::2, :]
    xm = jnp.concatenate([x0, x1, x2, x3], axis=-1)
    xm = xm.reshape(B, (H // 2) * (W // 2), 4 * C)
    mean = jnp.mean(xm, axis=-1, keepdims=True)
    var = jnp.mean((xm - mean) ** 2, axis=-1, keepdims=True)
    y = (xm - mean) / jnp.sqrt(var + 1e-5) * gamma + beta
    return jnp.einsum("blk,ok->blo", y, weight)


if __name__ == "__main__":
    def run_case(B, H, W, C, D, dtype, block_rows, tol):
        key = jax.random.PRNGKey(0)
        kx, kg, kb, kw = jax.random.split(key, 4)
        x = jax.random.normal(kx, (B, H * W, C), dtype=jnp.float32)
        gamma = 1.0 + 0.1 * jax.random.normal(kg, (4 * C,), dtype=jnp.float32)
        beta = 0.1 * jax.random.normal(kb, (4 * C,), dtype=jnp.float32)
        bound = (4 * C) ** -0.5
        weight = jax.random.uniform(kw, (D, 4 * C), jnp.float32, -bound, bound)

        x_d = x.astype(dtype)
        g_d = gamma.astype(dtype)
        b_d = beta.astype(dtype)
        w_d = weight.astype(dtype)

        out = patch_merging_forward(x_d, (H, W), g_d, b_d, w_d,
                                    block_rows=block_rows)
        out = jax.block_until_ready(out)

        ref = _reference_forward(x_d.astype(jnp.float32), (H, W),
                                 g_d.astype(jnp.float32),
                                 b_d.astype(jnp.float32),
                                 w_d.astype(jnp.float32))
        assert out.shape == (B, H * W // 4, D)
        err = float(jnp.max(jnp.abs(out.astype(jnp.float32) - ref)))
        assert jnp.allclose(out.astype(jnp.float32), ref, atol=tol, rtol=tol), err

    # Case 1: bf16 fast path, MXU-aligned (4C=256, D=128), 4-step row grid
    # (BH2=32 super-rows -> tbh=8 -> 128 merged rows/tile, grid=(4,)).
    run_case(B=2, H=32, W=32, C=64, D=128,
             dtype=jnp.bfloat16, block_rows=512, tol=8e-2)

    # Case 2: f32, un-padded narrow output (D=48, masked lane store, no slice)
    # and 2C % 128 != 0 so the fused K=4C concat path is exercised; grid=(4,).
    run_case(B=3, H=16, W=16, C=32, D=48,
             dtype=jnp.float32, block_rows=128, tol=2e-3)

    print("KERNEL_OK")
</pallas_src>

<mosaic_0001>
module attributes {stable_mosaic.version = 11 : i64} {
  func.func @_merge_ln_linear_kernel(%arg0: i32, %arg1: memref<8x2x16x128xbf16, #tpu.memory_space<vmem>>, %arg2: memref<256x128xbf16, #tpu.memory_space<vmem>>, %arg3: memref<1x128xf32, #tpu.memory_space<vmem>>, %arg4: memref<128x128xbf16, #tpu.memory_space<vmem>>) attributes {dimension_semantics = [#tpu.dimension_semantics<parallel>], iteration_bounds = array<i64: 4>, scalar_prefetch = 0 : i64, scratch_operands = 0 : i64, tpu.core_type = #tpu.core_type<tc>, window_params = [{transform_indices = @transform_0, window_bounds = array<i64: 8, 2, 16, 128>}, {pipeline_mode = #tpu.pipeline_mode<synchronous>, transform_indices = @transform_1, window_bounds = array<i64: 256, 128>}, {pipeline_mode = #tpu.pipeline_mode<synchronous>, transform_indices = @transform_2, window_bounds = array<i64: 1, 128>}, {transform_indices = @transform_3, window_bounds = array<i64: 128, 128>}]} {
    %c0 = arith.constant 0 : index
    %c0_0 = arith.constant 0 : index
    %c0_1 = arith.constant 0 : index
    %c0_2 = arith.constant 0 : index
    %0 = vector.load %arg1[%c0, %c0_0, %c0_1, %c0_2] : memref<8x2x16x128xbf16, #tpu.memory_space<vmem>>, vector<8x1x16x128xbf16>
    %1 = vector.shape_cast %0 : vector<8x1x16x128xbf16> to vector<8x16x128xbf16>
    %2 = vector.shape_cast %1 : vector<8x16x128xbf16> to vector<128x128xbf16>
    %3 = arith.extf %2 : vector<128x128xbf16> to vector<128x128xf32>
    %c0_3 = arith.constant 0 : index
    %c1 = arith.constant 1 : index
    %c0_4 = arith.constant 0 : index
    %c0_5 = arith.constant 0 : index
    %4 = vector.load %arg1[%c0_3, %c1, %c0_4, %c0_5] : memref<8x2x16x128xbf16, #tpu.memory_space<vmem>>, vector<8x1x16x128xbf16>
    %5 = vector.shape_cast %4 : vector<8x1x16x128xbf16> to vector<8x16x128xbf16>
    %6 = vector.shape_cast %5 : vector<8x16x128xbf16> to vector<128x128xbf16>
    %7 = arith.extf %6 : vector<128x128xbf16> to vector<128x128xf32>
    %cst = arith.constant dense<0.000000e+00> : vector<128xf32>
    %8 = vector.multi_reduction <add>, %3, %cst [1] : vector<128x128xf32> to vector<128xf32>
    %9 = vector.shape_cast %8 : vector<128xf32> to vector<128x1xf32>
    %cst_6 = arith.constant dense<0.000000e+00> : vector<128xf32>
    %10 = vector.multi_reduction <add>, %7, %cst_6 [1] : vector<128x128xf32> to vector<128xf32>
    %11 = vector.shape_cast %10 : vector<128xf32> to vector<128x1xf32>
    %12 = arith.addf %9, %11 : vector<128x1xf32>
    %13 = arith.mulf %3, %3 : vector<128x128xf32>
    %cst_7 = arith.constant dense<0.000000e+00> : vector<128xf32>
    %14 = vector.multi_reduction <add>, %13, %cst_7 [1] : vector<128x128xf32> to vector<128xf32>
    %15 = vector.shape_cast %14 : vector<128xf32> to vector<128x1xf32>
    %16 = arith.mulf %7, %7 : vector<128x128xf32>
    %cst_8 = arith.constant dense<0.000000e+00> : vector<128xf32>
    %17 = vector.multi_reduction <add>, %16, %cst_8 [1] : vector<128x128xf32> to vector<128xf32>
    %18 = vector.shape_cast %17 : vector<128xf32> to vector<128x1xf32>
    %19 = arith.addf %15, %18 : vector<128x1xf32>
    %cst_9 = arith.constant 3.906250e-03 : f32
    %20 = vector.broadcast %cst_9 : f32 to vector<128x1xf32>
    %21 = arith.mulf %12, %20 : vector<128x1xf32>
    %cst_10 = arith.constant 3.906250e-03 : f32
    %22 = vector.broadcast %cst_10 : f32 to vector<128x1xf32>
    %23 = arith.mulf %19, %22 : vector<128x1xf32>
    %24 = arith.mulf %21, %21 : vector<128x1xf32>
    %25 = arith.subf %23, %24 : vector<128x1xf32>
    %cst_11 = arith.constant 0.000000e+00 : f32
    %26 = vector.broadcast %cst_11 : f32 to vector<128x1xf32>
    %27 = arith.maximumf %25, %26 : vector<128x1xf32>
    %cst_12 = arith.constant 9.99999974E-6 : f32
    %28 = vector.broadcast %cst_12 : f32 to vector<128x1xf32>
    %29 = arith.addf %27, %28 : vector<128x1xf32>
    %30 = math.rsqrt %29 : vector<128x1xf32>
    %31 = tpu.concatenate %3, %7 in 1 : vector<128x128xf32>, vector<128x128xf32> -> vector<128x256xf32>
    %32 = vector.broadcast %21 : vector<128x1xf32> to vector<128x256xf32>
    %33 = arith.subf %31, %32 : vector<128x256xf32>
    %34 = vector.broadcast %30 : vector<128x1xf32> to vector<128x256xf32>
    %35 = arith.mulf %33, %34 : vector<128x256xf32>
    %36 = arith.truncf %35 : vector<128x256xf32> to vector<128x256xbf16>
    %c0_13 = arith.constant 0 : index
    %c0_14 = arith.constant 0 : index
    %37 = vector.load %arg2[%c0_13, %c0_14] : memref<256x128xbf16, #tpu.memory_space<vmem>>, vector<256x128xbf16>
    %cst_15 = arith.constant dense<0.000000e+00> : vector<128x128xf32>
    %38 = tpu.matmul %36, %37, %cst_15 {dimension_numbers = #tpu.dot_dimension_numbers<[1], [0], [0], [1], [0, 0, 1, 1], [], []>} : vector<128x256xbf16>, vector<256x128xbf16>, vector<128x128xf32> -> vector<128x128xf32>
    %c0_16 = arith.constant 0 : index
    %c0_17 = arith.constant 0 : index
    %39 = vector.load %arg3[%c0_16, %c0_17] : memref<1x128xf32, #tpu.memory_space<vmem>>, vector<1x128xf32>
    %40 = vector.broadcast %39 : vector<1x128xf32> to vector<128x128xf32>
    %41 = arith.addf %38, %40 : vector<128x128xf32>
    %42 = arith.truncf %41 : vector<128x128xf32> to vector<128x128xbf16>
    %c0_18 = arith.constant 0 : index
    %c0_19 = arith.constant 0 : index
    %43 = vector.load %arg4[%c0_18, %c0_19] : memref<128x128xbf16, #tpu.memory_space<vmem>>, vector<128x128xbf16>
    tpu.vector_store %arg4[%c0_18, %c0_19], %42 {strides = array<i32>} : memref<128x128xbf16, #tpu.memory_space<vmem>>, vector<128x128xbf16>,
    return
  }
  func.func @transform_0(%arg0: i32) -> (i32, i32, i32, i32) {
    %c0_i32 = arith.constant 0 : i32
    %c0_i32_0 = arith.constant 0 : i32
    %c0_i32_1 = arith.constant 0 : i32
    %c0_i32_2 = arith.constant 0 : i32
    return %arg0, %c0_i32, %c0_i32_0, %c0_i32_1 : i32, i32, i32, i32
  }
  func.func @transform_1(%arg0: i32) -> (i32, i32) {
    %c0_i32 = arith.constant 0 : i32
    %c0_i32_0 = arith.constant 0 : i32
    %c0_i32_1 = arith.constant 0 : i32
    return %c0_i32, %c0_i32_0 : i32, i32
  }
  func.func @transform_2(%arg0: i32) -> (i32, i32) {
    %c0_i32 = arith.constant 0 : i32
    %c0_i32_0 = arith.constant 0 : i32
    %c0_i32_1 = arith.constant 0 : i32
    return %c0_i32, %c0_i32_0 : i32, i32
  }
  func.func @transform_3(%arg0: i32) -> (i32, i32) {
    %c0_i32 = arith.constant 0 : i32
    %c0_i32_0 = arith.constant 0 : i32
    return %arg0, %c0_i32 : i32, i32
  }
}

module attributes {stable_mosaic.version = 11 : i64} {
  func.func @_merge_ln_linear_kernel(%arg0: i32, %arg1: memref<8x2x16x128xbf16, #tpu.memory_space<vmem>>, %arg2: memref<256x128xbf16, #tpu.memory_space<vmem>>, %arg3: memref<1x128xf32, #tpu.memory_space<vmem>>, %arg4: memref<128x128xbf16, #tpu.memory_space<vmem>>) attributes {dimension_semantics = [#tpu.dimension_semantics<parallel>], iteration_bounds = array<i64: 4>, scalar_prefetch = 0 : i64, scratch_operands = 0 : i64, tpu.core_type = #tpu.core_type<tc>, window_params = [{transform_indices = @transform_0, window_bounds = array<i64: 8, 2, 16, 128>}, {pipeline_mode = #tpu.pipeline_mode<synchronous>, transform_indices = @transform_1, window_bounds = array<i64: 256, 128>}, {pipeline_mode = #tpu.pipeline_mode<synchronous>, transform_indices = @transform_2, window_bounds = array<i64: 1, 128>}, {transform_indices = @transform_3, window_bounds = array<i64: 128, 128>}]} {
    %c0 = arith.constant 0 : index
    %c0_0 = arith.constant 0 : index
    %c0_1 = arith.constant 0 : index
    %c0_2 = arith.constant 0 : index
    %0 = vector.load %arg1[%c0, %c0_0, %c0_1, %c0_2] : memref<8x2x16x128xbf16, #tpu.memory_space<vmem>>, vector<8x1x16x128xbf16>
    %1 = vector.shape_cast %0 : vector<8x1x16x128xbf16> to vector<8x16x128xbf16>
    %2 = vector.shape_cast %1 : vector<8x16x128xbf16> to vector<128x128xbf16>
    %3 = arith.extf %2 : vector<128x128xbf16> to vector<128x128xf32>
    %c0_3 = arith.constant 0 : index
    %c1 = arith.constant 1 : index
    %c0_4 = arith.constant 0 : index
    %c0_5 = arith.constant 0 : index
    %4 = vector.load %arg1[%c0_3, %c1, %c0_4, %c0_5] : memref<8x2x16x128xbf16, #tpu.memory_space<vmem>>, vector<8x1x16x128xbf16>
    %5 = vector.shape_cast %4 : vector<8x1x16x128xbf16> to vector<8x16x128xbf16>
    %6 = vector.shape_cast %5 : vector<8x16x128xbf16> to vector<128x128xbf16>
    %7 = arith.extf %6 : vector<128x128xbf16> to vector<128x128xf32>
    %cst = arith.constant dense<0.000000e+00> : vector<128xf32>
    %8 = vector.multi_reduction <add>, %3, %cst [1] : vector<128x128xf32> to vector<128xf32>
    %9 = vector.shape_cast %8 : vector<128xf32> to vector<128x1xf32>
    %cst_6 = arith.constant dense<0.000000e+00> : vector<128xf32>
    %10 = vector.multi_reduction <add>, %7, %cst_6 [1] : vector<128x128xf32> to vector<128xf32>
    %11 = vector.shape_cast %10 : vector<128xf32> to vector<128x1xf32>
    %12 = arith.addf %9, %11 : vector<128x1xf32>
    %13 = arith.mulf %3, %3 : vector<128x128xf32>
    %cst_7 = arith.constant dense<0.000000e+00> : vector<128xf32>
    %14 = vector.multi_reduction <add>, %13, %cst_7 [1] : vector<128x128xf32> to vector<128xf32>
    %15 = vector.shape_cast %14 : vector<128xf32> to vector<128x1xf32>
    %16 = arith.mulf %7, %7 : vector<128x128xf32>
    %cst_8 = arith.constant dense<0.000000e+00> : vector<128xf32>
    %17 = vector.multi_reduction <add>, %16, %cst_8 [1] : vector<128x128xf32> to vector<128xf32>
    %18 = vector.shape_cast %17 : vector<128xf32> to vector<128x1xf32>
    %19 = arith.addf %15, %18 : vector<128x1xf32>
    %cst_9 = arith.constant 3.906250e-03 : f32
    %20 = vector.broadcast %cst_9 : f32 to vector<128x1xf32>
    %21 = arith.mulf %12, %20 : vector<128x1xf32>
    %cst_10 = arith.constant 3.906250e-03 : f32
    %22 = vector.broadcast %cst_10 : f32 to vector<128x1xf32>
    %23 = arith.mulf %19, %22 : vector<128x1xf32>
    %24 = arith.mulf %21, %21 : vector<128x1xf32>
    %25 = arith.subf %23, %24 : vector<128x1xf32>
    %cst_11 = arith.constant 0.000000e+00 : f32
    %26 = vector.broadcast %cst_11 : f32 to vector<128x1xf32>
    %27 = arith.maximumf %25, %26 : vector<128x1xf32>
    %cst_12 = arith.constant 9.99999974E-6 : f32
    %28 = vector.broadcast %cst_12 : f32 to vector<128x1xf32>
    %29 = arith.addf %27, %28 : vector<128x1xf32>
    %30 = math.rsqrt %29 : vector<128x1xf32>
    %31 = tpu.concatenate %3, %7 in 1 : vector<128x128xf32>, vector<128x128xf32> -> vector<128x256xf32>
    %32 = vector.broadcast %21 : vector<128x1xf32> to vector<128x256xf32>
    %33 = arith.subf %31, %32 : vector<128x256xf32>
    %34 = vector.broadcast %30 : vector<128x1xf32> to vector<128x256xf32>
    %35 = arith.mulf %33, %34 : vector<128x256xf32>
    %36 = arith.truncf %35 : vector<128x256xf32> to vector<128x256xbf16>
    %c0_13 = arith.constant 0 : index
    %c0_14 = arith.constant 0 : index
    %37 = vector.load %arg2[%c0_13, %c0_14] : memref<256x128xbf16, #tpu.memory_space<vmem>>, vector<256x128xbf16>
    %cst_15 = arith.constant dense<0.000000e+00> : vector<128x128xf32>
    %38 = tpu.matmul %36, %37, %cst_15 {dimension_numbers = #tpu.dot_dimension_numbers<[1], [0], [0], [1], [0, 0, 1, 1], [], []>} : vector<128x256xbf16>, vector<256x128xbf16>, vector<128x128xf32> -> vector<128x128xf32>
    %c0_16 = arith.constant 0 : index
    %c0_17 = arith.constant 0 : index
    %39 = vector.load %arg3[%c0_16, %c0_17] : memref<1x128xf32, #tpu.memory_space<vmem>>, vector<1x128xf32>
    %40 = vector.broadcast %39 : vector<1x128xf32> to vector<128x128xf32>
    %41 = arith.addf %38, %40 : vector<128x128xf32>
    %42 = arith.truncf %41 : vector<128x128xf32> to vector<128x128xbf16>
    %c0_18 = arith.constant 0 : index
    %c0_19 = arith.constant 0 : index
    %43 = vector.load %arg4[%c0_18, %c0_19] : memref<128x128xbf16, #tpu.memory_space<vmem>>, vector<128x128xbf16>
    tpu.vector_store %arg4[%c0_18, %c0_19], %42 {strides = array<i32>} : memref<128x128xbf16, #tpu.memory_space<vmem>>, vector<128x128xbf16>,
    return
  }
  func.func @transform_0(%arg0: i32) -> (i32, i32, i32, i32) {
    %c0_i32 = arith.constant 0 : i32
    %c0_i32_0 = arith.constant 0 : i32
    %c0_i32_1 = arith.constant 0 : i32
    %c0_i32_2 = arith.constant 0 : i32
    return %arg0, %c0_i32, %c0_i32_0, %c0_i32_1 : i32, i32, i32, i32
  }
  func.func @transform_1(%arg0: i32) -> (i32, i32) {
    %c0_i32 = arith.constant 0 : i32
    %c0_i32_0 = arith.constant 0 : i32
    %c0_i32_1 = arith.constant 0 : i32
    return %c0_i32, %c0_i32_0 : i32, i32
  }
  func.func @transform_2(%arg0: i32) -> (i32, i32) {
    %c0_i32 = arith.constant 0 : i32
    %c0_i32_0 = arith.constant 0 : i32
    %c0_i32_1 = arith.constant 0 : i32
    return %c0_i32, %c0_i32_0 : i32, i32
  }
  func.func @transform_3(%arg0: i32) -> (i32, i32) {
    %c0_i32 = arith.constant 0 : i32
    %c0_i32_0 = arith.constant 0 : i32
    return %arg0, %c0_i32 : i32, i32
  }
}

</mosaic_0001>

<bundles_post_ra>
// kernel: tpu_custom_call.1
= control target key start
LH: loop header
LB: loop body
LE: loop exit
PB: predicated region body
PF: predicated region fallthrough
CT: control target
= control target key end

     0   :  { %8 = vsyncpa [#allocation3], 0  ;;  %s2100_s0 = inlined_call_operand.hbm [shape: bf16[32,2,16,128], index: 0, kind: input, shape index: {}]   ;;  %s2101_s1 = inlined_call_operand.hbm [shape: bf16[256,128], index: 1, kind: input, shape index: {}]   ;;  %s2102_s2 = inlined_call_operand.vmem [shape: f32[1,128], index: 2, kind: input, shape index: {}]   ;;  %s2103_s3 = inlined_call_operand.hbm [shape: bf16[512,128], index: 3, kind: output, shape index: {}]  }
   0x1   :  { %10 = vsyncpa [#allocation3 + $0x1], 0 }
   0x2   :  { %11 = vsyncpa [#allocation6], 0 }
   0x3   :  { %12 = vsyncpa [#allocation4], 0 }
   0x4   :  { %14 = vsyncpa [#allocation4 + $0x1], 0  ;;  %s1623_s12 = smov 0   ;;  %s1625_s13 = smov 0  }
   0x5   :  { %s1627_s14 = smov 0   ;;  %s1629_s15 = smov 0  }
   0x6 LB: > { %s1644_s16 = sadd.s32 4294967295, %s1594_s15   ;;  %s1066_s17 = sadd.s32 4294967294, %s1594_s15   ;;  %s1594_s15 = sphi %s1629_s15, %s2122_s15   ;;  %s1590_s14 = sphi %s1627_s14, %s2121_s14   ;;  %s1586_s13 = sphi %s1625_s13, %s2120_s13   ;;  %s1582_s12 = sphi %s1623_s12, %s2119_s12  }
   0x7   : > { %p40_p0 = scmp.ne.s32.totalorder %s1586_s13, %s1582_s12  ;;  %p2104_p1 = scmp.eq.s32.totalorder %s1644_s16, 0 }
   0x8   : > { %p112_p3 = scmp.eq.s32.totalorder %s1066_s17, 3  ;;  %p1067_p5 = scmp.ge.s32.totalorder %s1594_s15, 1 }
   0x9   : > { %p1653_p4 = por %p2104_p1, %p40_p0  ;;  %p119_p7 = scmp.lt.s32.totalorder %s1594_s15, 5 }
   0xa   : > { %p1658_p6 = por %p112_p3, %p40_p0  ;;  %s1596_s21 = smov [#allocation5]  }
   0xb   : > { %s2107_s18 = scalar_select %p1653_p4, 1, 0 }
   0xc   : > { %s2108_s19 = scalar_select %p1658_p6, 1, 0 }
   0xd   : > { %p1663_p8 = pnand %p1067_p5, %p119_p7  ;;  %s131_s22 = sshll.u32 %s1596_s21, 4  ;;  %s132_s22 = int_to_ptr.vmem [resolvable:$true] %s131_s22 }
   0xe   : > { %s1676_s24 = sadd.s32 1, %s1594_s15   ;;  %s27_s25 = sadd.s32 1, %s1590_s14 }
   0xf   : > { %s2109_s20 = scalar_select %p1663_p8, 1, 0 }
  0x10   : > { %p1365_p9 = pneg %p1663_p8  ;;  %s24_s26 = ssub.s32 %s1594_s15, %s1676_s24 }
  0x11   : > { %s1466_s29 = scalar_lea.hbm %s2101_s1, 2048 }
  0x12   : > { %p1671_p10 = pnand %p1365_p9, %p2104_p1  ;;  %p1467_p11 = scmp.ne.s32.totalorder %s2101_s1, %s1466_s29 }
  0x13   : > { %p1473_p3 = scmp.lt.u32.totalorder %s1466_s29, %s2101_s1 }
  0x14   : > { %p1468_p12 = pneg %p1671_p10 }
  0x16   : > { %p1469_p13 = pnand %p1468_p12, %p1467_p11 }
  0x18   : > { %p1470_p0 = pneg %p1469_p13 }
  0x1a   : > { %p1475_p5 = pnand %p1473_p3, %p1470_p0 }
  0x1c   : > { %1478 = shalt.err (!%p1475_p5)
}
  0x1d   : > { %s1479_s7 = scalar_lea.vmem %s132_s22, 2048  ;;  %p1487_p2 = scmp.lt.s32.totalorder %s132_s22, %s132_s22 }
  0x1e   : > { %p1480_p7 = scmp.ne.s32.totalorder %s132_s22, %s1479_s7  ;;  %p1488_p6 = scmp.lt.s32.totalorder %s1479_s7, %s1479_s7 }
  0x20   : > { %p1482_p9 = pnand %p1480_p7, %p1468_p12  ;;  %p1489_p4 = por %p1488_p6, %p1487_p2 }
  0x22   : > { %p1483_p1 = pneg %p1482_p9 }
  0x24   : > { %p1490_p8 = pnand %p1489_p4, %p1483_p1 }
  0x26   : > { %1493 = shalt.err (!%p1490_p8)
}
  0x27   : > { %s1597_s8 = smov 64   ;;  %s1598_s9 = smov 4  }
  0x28   : > { %1368 = dma.hbm_to_vmem [thread:$0]  (!%p1671_p10), %s2101_s1, 2048, %s132_s22, [#allocation6], %s1597_s8, %s1597_s8, %s1598_s9  }
  0x29   : > { %p25_p1 = scmp.eq.s32.totalorder %s24_s26, 0  ;;  %p34_p2 = scmp.ne.s32.totalorder %s1590_s14, %s1586_s13 }
  0x2a   : > { %p35_p4 = scmp.eq.s32.totalorder %s1594_s15, 0  ;;  %p1378_p6 = scmp.lt.s32.totalorder %s1594_s15, 4 }
  0x2b   : > { %s1705_s17 = scalar_select %p25_p1, %s1590_s14, %s27_s25  }
  0x2c   : > { %p36_p8 = por %p35_p4, %p34_p2  ;;  %p2111_p11 = scmp.eq.s32.totalorder %s1644_s16, 3 }
  0x2d   : > { %s148_s23 = sand.u32 1, %s1590_s14   ;;  %s1133_s27 = sshll.u32 %s1594_s15, 11 }
  0x2e   : > { %p1709_p12 = por %p2111_p11, %p34_p2  ;;  %s1070_s28 = sshll.u32 %s148_s23, 7 }
  0x2f   : > { %s1718_s4 = scalar_lea.hbm %s2100_s0, %s1133_s27  ;;  %s152_s22 = scalar_lea.vmem [#allocation2], %s1070_s28 }
  0x30   : > { %s160_s25 = sshll.u32 %s152_s22, 4  ;;  %p1720_p10 = pnand %p1378_p6, %p36_p8  ;;  %s1724_s25 = int_to_ptr.vmem [resolvable:$true] %s160_s25 }
  0x31   : > { %s1726_s5 = scalar_lea.sflag [#allocation3], %s148_s23  ;;  %s1494_s6 = scalar_lea.hbm %s1718_s4, 2048 }
  0x32   : > { %p1495_p13 = scmp.ne.s32.totalorder %s1718_s4, %s1494_s6  ;;  %p1496_p0 = pneg %p1720_p10 }
  0x33   : > { %s1499_s11 = scalar_lea.hbm %s2100_s0, 8192  ;;  %p1500_p7 = scmp.lt.u32.totalorder %s1718_s4, %s2100_s0 }
  0x34   : > { %p1497_p3 = pnand %p1496_p0, %p1495_p13  ;;  %p1501_p9 = scmp.lt.u32.totalorder %s1499_s11, %s1494_s6 }
  0x35   : > { %p1503_p2 = scmp.lt.u32.totalorder %s1494_s6, %s1718_s4 }
  0x36   : > { %p1498_p5 = pneg %p1497_p3  ;;  %p1502_p1 = por %p1501_p9, %p1500_p7 }
  0x38   : > { %p1504_p4 = por %p1503_p2, %p1502_p1 }
  0x3a   : > { %p1505_p6 = pnand %p1504_p4, %p1498_p5 }
  0x3c   : > { %1508 = shalt.err (!%p1505_p6)
}
  0x3d   : > { %s1509_s23 = scalar_lea.vmem %s1724_s25, 2048  ;;  %s1599_s29 = smov [#allocation2]  }
  0x3e   : > { %p1510_p8 = scmp.ne.s32.totalorder %s1724_s25, %s1509_s23  ;;  %s1514_s30 = sshll.u32 %s1599_s29, 4  ;;  %s1515_s30 = int_to_ptr.vmem [resolvable:$false] %s1514_s30 }
  0x3f   : > { %s1516_s22 = scalar_lea.vmem %s1515_s30, 4096  ;;  %p1517_p3 = scmp.lt.s32.totalorder %s1724_s25, %s1515_s30 }
  0x40   : > { %p1512_p11 = pnand %p1510_p8, %p1496_p0  ;;  %p1518_p7 = scmp.lt.s32.totalorder %s1516_s22, %s1509_s23 }
  0x42   : > { %p1513_p13 = pneg %p1512_p11  ;;  %p1519_p9 = por %p1518_p7, %p1517_p3 }
  0x44   : > { %p1520_p1 = pnand %p1519_p9, %p1513_p13 }
  0x46   : > { %1523 = shalt.err (!%p1520_p1)
}
  0x47   : > { %1372 = dma.hbm_to_vmem [thread:$0]  (!%p1720_p10), %s1718_s4, 2048, %s1724_s25, %s1726_s5, %s1597_s8, %s1597_s8, %s1598_s9  }
  0x48   : > { %p2114_p0 = scmp.ne.s32.totalorder %s2109_s20, 0 }
  0x49   : > { %s1760_s6 = sand.u32 (!%p2114_p0), 1, %s1586_s13   ;;  %p2115_p5 = scmp.ne.s32.totalorder (!%p2114_p0), %s2107_s18, 0 }
  0x4a   : > { %172 = sbr.rel (%p2114_p0) target bundleno = 617 (0x269), region = 32  ;;  %s1075_s7 = sshll.u32 (!%p2114_p0), %s1760_s6, 7 }
  0x4b   : > { %s175_s10 = scalar_lea.sflag (!%p2114_p0), [#allocation3], %s1760_s6  ;;  %s1764_s11 = scalar_lea.vmem (!%p2114_p0), [#allocation2], %s1075_s7 }
  0x51   : > { %1569 = dma.done.wait (%p2115_p5), %s175_s10, 2048  }
  0x52   : > { %1571 = vsyncadd (%p2115_p5), %s175_s10, 4294965248  ;;  %p2116_p10 = scmp.eq.s32.totalorder %s1644_s16, 0 }
  0x54   : > { %1573 = dma.done.wait (%p2116_p10), [#allocation6], 2048   ;;  %p2117_p2 = pmov %p2116_p10 }
  0x55   : > { %v1258_v0 = vld [vmem:[%s1764_s11 + $0x40] sm:$0xff]   ;;  %v1262_v6 = vld [vmem:[%s1764_s11 + $0x8] sm:$0xff]   ;;  %v1255_v20 = vld [vmem:[%s1764_s11 + $0x10] sm:$0xff]   ;;  %s1077_s8 = sshll.u32 %s1760_s6, 6  ;;  %s1150_s4 = sshll.u32 %s1644_s16, 10 }
  0x56   : > { %1575 = vsyncadd (%p2117_p2), [#allocation6], 4294965248  ;;  %v1152_v1 = vld [vmem:[%s1764_s11] sm:$0xff]   ;;  %v1776_v2 = vunpack.c.l.bf16 %v1258_v0  ;;  %v1782_v4 = vunpack.c.h.bf16 %v1258_v0  ;;  %v1266_v7 = vld [vmem:[%s1764_s11 + $0x48] sm:$0xff]   ;;  %v1790_v8 = vunpack.c.h.bf16 %v1262_v6  ;;  %v1792_v9 = vunpack.c.l.bf16 %v1262_v6  ;;  %s2026_s9 = scalar_lea.vmem [#allocation7], %s1077_s8  ;;  %s2054_s27 = scalar_lea.hbm %s2103_s3, %s1150_s4 }
  0x57   : > { %v1778_v3 = vunpack.c.l.bf16 %v1152_v1  ;;  %v1784_v5 = vunpack.c.h.bf16 %v1152_v1  ;;  %v1796_v10 = vunpack.c.h.bf16 %v1266_v7  ;;  %v1798_v11 = vunpack.c.l.bf16 %v1266_v7  ;;  %v1259_v23 = vld [vmem:[%s1764_s11 + $0x50] sm:$0xff]   ;;  %v1418_v24 = vld [vmem:[#allocation5 + $0x40] sm:$0xff]   ;;  %v1263_v28 = vld [vmem:[%s1764_s11 + $0x18] sm:$0xff]   ;;  %s983_s25 = sshll.u32 %s2026_s9, 4  ;;  %s970_s28 = scalar_lea.sflag [#allocation4], %s1760_s6  ;;  %s2056_s25 = int_to_ptr.vmem [resolvable:$true] %s983_s25 }
  0x58   : > { %289 = vadd.xlane.f32.xlu1 %v1776_v2  ;;  %v362_v14 = vmul.f32 %v1782_v4, %v1782_v4  ;;  %v361_v15 = vmul.f32 %v1776_v2, %v1776_v2  ;;  %v402_v16 = vmul.f32 %v1790_v8, %v1790_v8  ;;  %v401_v17 = vmul.f32 %v1792_v9, %v1792_v9  ;;  %v1419_v25 = vld [vmem:[#allocation5] sm:$0xff]   ;;  %v1420_v29 = vld [vmem:[#allocation5 + $0x48] sm:$0xff]   ;;  %v1267_v33 = vld [vmem:[%s1764_s11 + $0x58] sm:$0xff]   ;;  %s1524_s16 = scalar_lea.vmem %s2056_s25, 1024  ;;  %s1600_s23 = smov [#allocation7]  }
  0x59   : > { %273 = vadd.xlane.f32.xlu0 %v1778_v3  ;;  %v354_v12 = vmul.f32 %v1784_v5, %v1784_v5  ;;  %v353_v13 = vmul.f32 %v1778_v3, %v1778_v3  ;;  %v410_v18 = vmul.f32 %v1796_v10, %v1796_v10  ;;  %v409_v19 = vmul.f32 %v1798_v11, %v1798_v11  ;;  %v1421_v30 = vld [vmem:[#allocation5 + $0x8] sm:$0xff]   ;;  %v1422_v34 = vld [vmem:[#allocation5 + $0x50] sm:$0xff]   ;;  %v1424_v38 = vld [vmem:[#allocation5 + $0x58] sm:$0xff]   ;;  %p1525_p4 = scmp.ne.s32.totalorder %s2056_s25, %s1524_s16  ;;  %s1528_s29 = sshll.u32 %s1600_s23, 4  ;;  %s1529_s29 = int_to_ptr.vmem [resolvable:$false] %s1528_s29 }
  0x5a   : > { %v1819_v21 = vunpack.c.h.bf16 %v1255_v20  ;;  %v1821_v22 = vunpack.c.l.bf16 %v1255_v20  ;;  %v1826_v26 = vunpack.c.h.bf16 %v1259_v23  ;;  %v1828_v27 = vunpack.c.l.bf16 %v1259_v23  ;;  %1277 = vmatprep.subr.bf16.mxu0 %v1418_v24  ;;  %1341 = vmatprep.subr.bf16.mxu1 %v1418_v24  ;;  %v1423_v37 = vld [vmem:[#allocation5 + $0x10] sm:$0xff]   ;;  %v1425_v41 = vld [vmem:[#allocation5 + $0x18] sm:$0xff]   ;;  %v1426_v42 = vld [vmem:[#allocation5 + $0x60] sm:$0xff]   ;;  %s1530_s30 = scalar_lea.vmem %s1529_s29, 2048  ;;  %p1531_p11 = scmp.lt.s32.totalorder %s2056_s25, %s1529_s29 }
  0x5b   : > { %1278 = vmatpush3.bf16.msra.mxu0 %v1419_v25  ;;  %1349 = vmatpush3.bf16.msra.mxu1 %v1419_v25  ;;  %v1833_v31 = vunpack.c.h.bf16 %v1263_v28  ;;  %v1835_v32 = vunpack.c.l.bf16 %v1263_v28  ;;  %v1840_v35 = vunpack.c.h.bf16 %v1267_v33  ;;  %v1842_v36 = vunpack.c.l.bf16 %v1267_v33  ;;  %v1427_v45 = vld [vmem:[#allocation5 + $0x20] sm:$0xff]   ;;  %v1428_v46 = vld [vmem:[#allocation5 + $0x68] sm:$0xff]   ;;  %v1430_v50 = vld [vmem:[#allocation5 + $0x70] sm:$0xff]   ;;  %p1526_p6 = pnand %p1525_p4, %p1709_p12  ;;  %p1532_p13 = scmp.lt.s32.totalorder %s1530_s30, %s1524_s16 }
  0x5c   : > { %291 = vadd.xlane.f32.xlu1 %v1782_v4  ;;  %1279 = vmatprep.subr.bf16.mxu0 %v1420_v29  ;;  %v356_v39 = vmul.f32 %v1819_v21, %v1819_v21  ;;  %v355_v40 = vmul.f32 %v1821_v22, %v1821_v22  ;;  %v364_v43 = vmul.f32 %v1826_v26, %v1826_v26  ;;  %v1429_v49 = vld [vmem:[#allocation5 + $0x28] sm:$0xff]   ;;  %v1431_v53 = vld [vmem:[#allocation5 + $0x30] sm:$0xff]   ;;  %v1256_v54 = vld [vmem:[%s1764_s11 + $0x20] sm:$0xff]  }
  0x5d   : > { %275 = vadd.xlane.f32.xlu0 %v1784_v5  ;;  %1342 = vmatprep.subr.bf16.mxu1 %v1420_v29  ;;  %v363_v44 = vmul.f32 %v1828_v27, %v1828_v27  ;;  %v404_v47 = vmul.f32 %v1833_v31, %v1833_v31  ;;  %v403_v48 = vmul.f32 %v1835_v32, %v1835_v32  ;;  %v1432_v55 = vld [vmem:[#allocation5 + $0x78] sm:$0xff]   ;;  %v1863_v56 = vunpack.c.h.bf16 %v1256_v54  ;;  %v1260_v59 = vld [vmem:[%s1764_s11 + $0x60] sm:$0xff]   ;;  %v1264_v62 = vld [vmem:[%s1764_s11 + $0x28] sm:$0xff]   ;;  %p1527_p8 = pneg %p1526_p6  ;;  %p1533_p3 = por %p1532_p13, %p1531_p11 }
  0x5e   : > { %v412_v51 = vmul.f32 %v1840_v35, %v1840_v35  ;;  %v411_v52 = vmul.f32 %v1842_v36, %v1842_v36  ;;  %v1865_v57 = vunpack.c.l.bf16 %v1256_v54  ;;  %v1433_v58 = vld [vmem:[#allocation5 + $0x38] sm:$0xff]   ;;  %v1870_v60 = vunpack.c.h.bf16 %v1260_v59  ;;  %v1268_v1 = vld [vmem:[%s1764_s11 + $0x68] sm:$0xff]   ;;  %v1257_v20 = vld [vmem:[%s1764_s11 + $0x30] sm:$0xff]  }
  0x5f   : > { %1280 = vmatpush3.bf16.msra.mxu0 %v1421_v30  ;;  %1350 = vmatpush3.bf16.msra.mxu1 %v1421_v30  ;;  %v1872_v61 = vunpack.c.l.bf16 %v1260_v59  ;;  %v1877_v63 = vunpack.c.h.bf16 %v1264_v62  ;;  %v1879_v0 = vunpack.c.l.bf16 %v1264_v62  ;;  %v1884_v6 = vunpack.c.h.bf16 %v1268_v1  ;;  %v1261_v25 = vld [vmem:[%s1764_s11 + $0x70] sm:$0xff]   ;;  %v1265_v30 = vld [vmem:[%s1764_s11 + $0x38] sm:$0xff]   ;;  %p1534_p7 = pnand %p1533_p3, %p1527_p8 }
  0x60   : > { %307 = vadd.xlane.f32.xlu1 %v1790_v8  ;;  %1281 = vmatprep.subr.bf16.mxu0 %v1422_v34  ;;  %v1886_v7 = vunpack.c.l.bf16 %v1268_v1  ;;  %v1907_v23 = vunpack.c.h.bf16 %v1257_v20  ;;  %v1909_v24 = vunpack.c.l.bf16 %v1257_v20  ;;  %v1914_v28 = vunpack.c.h.bf16 %v1261_v25 }
  0x61   : > { %305 = vadd.xlane.f32.xlu0 %v1792_v9  ;;  %1343 = vmatprep.subr.bf16.mxu1 %v1422_v34  ;;  %v1916_v29 = vunpack.c.l.bf16 %v1261_v25  ;;  %v1921_v33 = vunpack.c.h.bf16 %v1265_v30  ;;  %v1923_v34 = vunpack.c.l.bf16 %v1265_v30 }
  0x63   : > { %1282 = vmatpush3.bf16.msra.mxu0 %v1423_v37  ;;  %1351 = vmatpush3.bf16.msra.mxu1 %v1423_v37  ;;  %v1269_v37 = vld [vmem:[%s1764_s11 + $0x78] sm:$0xff]  }
  0x64   : > { %323 = vadd.xlane.f32.xlu1 %v1796_v10  ;;  %1283 = vmatprep.subr.bf16.mxu0 %v1424_v38 }
  0x65   : > { %321 = vadd.xlane.f32.xlu0 %v1798_v11  ;;  %1344 = vmatprep.subr.bf16.mxu1 %v1424_v38  ;;  %v1928_v38 = vunpack.c.h.bf16 %v1269_v37 }
  0x67   : > { %1284 = vmatpush3.bf16.msra.mxu0 %v1425_v41  ;;  %1352 = vmatpush3.bf16.msra.mxu1 %v1425_v41  ;;  %v359_v41 = vmul.f32 %v1909_v24, %v1909_v24 }
  0x68   : > { %371 = vadd.xlane.f32.xlu1 %v354_v12  ;;  %1285 = vmatprep.subr.bf16.mxu0 %v1426_v42  ;;  %v358_v12 = vmul.f32 %v1863_v56, %v1863_v56 }
  0x69   : > { %369 = vadd.xlane.f32.xlu0 %v353_v13  ;;  %1345 = vmatprep.subr.bf16.mxu1 %v1426_v42  ;;  %v357_v13 = vmul.f32 %v1865_v57, %v1865_v57  ;;  %v368_v42 = vmul.f32 %v1914_v28, %v1914_v28 }
  0x6b   : > { %1286 = vmatpush3.bf16.msra.mxu0 %v1427_v45  ;;  %1353 = vmatpush3.bf16.msra.mxu1 %v1427_v45  ;;  %v407_v45 = vmul.f32 %v1923_v34, %v1923_v34 }
  0x6c   : > { %387 = vadd.xlane.f32.xlu1 %v362_v14  ;;  %1287 = vmatprep.subr.bf16.mxu0 %v1428_v46  ;;  %v366_v14 = vmul.f32 %v1870_v60, %v1870_v60 }
  0x6d   : > { %385 = vadd.xlane.f32.xlu0 %v361_v15  ;;  %1346 = vmatprep.subr.bf16.mxu1 %v1428_v46  ;;  %v365_v15 = vmul.f32 %v1872_v61, %v1872_v61  ;;  %v416_v46 = vmul.f32 %v1928_v38, %v1928_v38 }
  0x6f   : > { %1288 = vmatpush3.bf16.msra.mxu0 %v1429_v49  ;;  %1354 = vmatpush3.bf16.msra.mxu1 %v1429_v49 }
  0x70   : > { %419 = vadd.xlane.f32.xlu1 %v402_v16  ;;  %1289 = vmatprep.subr.bf16.mxu0 %v1430_v50  ;;  %v406_v16 = vmul.f32 %v1877_v63, %v1877_v63 }
  0x71   : > { %417 = vadd.xlane.f32.xlu0 %v401_v17  ;;  %1347 = vmatprep.subr.bf16.mxu1 %v1430_v50  ;;  %v405_v17 = vmul.f32 %v1879_v0, %v1879_v0 }
  0x73   : > { %1290 = vmatpush3.bf16.msra.mxu0 %v1431_v53  ;;  %1355 = vmatpush3.bf16.msra.mxu1 %v1431_v53 }
  0x74   : > { %435 = vadd.xlane.f32.xlu1 %v410_v18  ;;  %1291 = vmatprep.subr.bf16.mxu0 %v1432_v55  ;;  %v414_v18 = vmul.f32 %v1884_v6, %v1884_v6 }
  0x75   : > { %433 = vadd.xlane.f32.xlu0 %v409_v19  ;;  %1348 = vmatprep.subr.bf16.mxu1 %v1432_v55  ;;  %v413_v19 = vmul.f32 %v1886_v7, %v1886_v7 }
  0x77   : > { %1292 = vmatpush3.bf16.msra.mxu0 %v1433_v58  ;;  %1356 = vmatpush3.bf16.msra.mxu1 %v1433_v58 }
  0x78   : > { %279 = vadd.xlane.f32.xlu1 %v1819_v21 }
  0x79   : > { %277 = vadd.xlane.f32.xlu0 %v1821_v22 }
  0x7c   : > { %295 = vadd.xlane.f32.xlu1 %v1826_v26 }
  0x7d   : > { %293 = vadd.xlane.f32.xlu0 %v1828_v27 }
  0x80   : > { %311 = vadd.xlane.f32.xlu1 %v1833_v31 }
  0x81   : > { %309 = vadd.xlane.f32.xlu0 %v1835_v32 }
  0x84   : > { %327 = vadd.xlane.f32.xlu1 %v1840_v35 }
  0x85   : > { %325 = vadd.xlane.f32.xlu0 %v1842_v36 }
  0x88   : > { %375 = vadd.xlane.f32.xlu1 %v356_v39  ;;  %v1930_v39 = vunpack.c.l.bf16 %v1269_v37 }
  0x89   : > { %373 = vadd.xlane.f32.xlu0 %v355_v40  ;;  %v360_v40 = vmul.f32 %v1907_v23, %v1907_v23 }
  0x8c   : > { %391 = vadd.xlane.f32.xlu1 %v364_v43  ;;  %v367_v43 = vmul.f32 %v1916_v29, %v1916_v29 }
  0x8d   : > { %389 = vadd.xlane.f32.xlu0 %v363_v44  ;;  %v408_v44 = vmul.f32 %v1921_v33, %v1921_v33 }
  0x90   : > { %423 = vadd.xlane.f32.xlu1 %v404_v47  ;;  %v415_v47 = vmul.f32 %v1930_v39, %v1930_v39 }
  0x91   : > { %421 = vadd.xlane.f32.xlu0 %v403_v48 }
  0x94   : > { %439 = vadd.xlane.f32.xlu1 %v412_v51 }
  0x95   : > { %437 = vadd.xlane.f32.xlu0 %v411_v52 }
  0x98   : > { %283 = vadd.xlane.f32.xlu1 %v1863_v56 }
  0x99   : > { %281 = vadd.xlane.f32.xlu0 %v1865_v57 }
  0x9c   : > { %299 = vadd.xlane.f32.xlu1 %v1870_v60 }
  0x9d   : > { %297 = vadd.xlane.f32.xlu0 %v1872_v61 }
  0xa0   : > { %315 = vadd.xlane.f32.xlu1 %v1877_v63 }
  0xa1   : > { %313 = vadd.xlane.f32.xlu0 %v1879_v0 }
  0xa4   : > { %331 = vadd.xlane.f32.xlu1 %v1884_v6 }
  0xa5   : > { %329 = vadd.xlane.f32.xlu0 %v1886_v7 }
  0xa8   : > { %379 = vadd.xlane.f32.xlu1 %v358_v12 }
  0xa9   : > { %377 = vadd.xlane.f32.xlu0 %v357_v13 }
  0xac   : > { %395 = vadd.xlane.f32.xlu1 %v366_v14 }
  0xad   : > { %393 = vadd.xlane.f32.xlu0 %v365_v15 }
  0xb0   : > { %427 = vadd.xlane.f32.xlu1 %v406_v16 }
  0xb1   : > { %425 = vadd.xlane.f32.xlu0 %v405_v17 }
  0xb4   : > { %443 = vadd.xlane.f32.xlu1 %v414_v18 }
  0xb5   : > { %441 = vadd.xlane.f32.xlu0 %v413_v19 }
  0xb8   : > { %287 = vadd.xlane.f32.xlu1 %v1907_v23 }
  0xb9   : > { %285 = vadd.xlane.f32.xlu0 %v1909_v24 }
  0xbc   : > { %303 = vadd.xlane.f32.xlu1 %v1914_v28 }
  0xbd   : > { %301 = vadd.xlane.f32.xlu0 %v1916_v29 }
  0xc0   : > { %319 = vadd.xlane.f32.xlu1 %v1921_v33 }
  0xc1   : > { %317 = vadd.xlane.f32.xlu0 %v1923_v34 }
  0xc4   : > { %335 = vadd.xlane.f32.xlu1 %v1928_v38 }
  0xc5   : > { %333 = vadd.xlane.f32.xlu0 %v1930_v39 }
  0xc8   : > { %383 = vadd.xlane.f32.xlu1 %v360_v40 }
  0xc9   : > { %381 = vadd.xlane.f32.xlu0 %v359_v41 }
  0xcc   : > { %399 = vadd.xlane.f32.xlu1 %v368_v42 }
  0xcd   : > { %397 = vadd.xlane.f32.xlu0 %v367_v43 }
  0xd0   : > { %431 = vadd.xlane.f32.xlu1 %v408_v44 }
  0xd1   : > { %429 = vadd.xlane.f32.xlu0 %v407_v45 }
  0xd4   : > { %447 = vadd.xlane.f32.xlu1 %v416_v46 }
  0xd5   : > { %445 = vadd.xlane.f32.xlu0 %v415_v47 }
  0xe5   : > { %v290_v48 = vpop.xlane.xlu1 %289 }
  0xe6   : > { %v274_v49 = vpop.xlane.xlu0 %273 }
  0xe9   : > { %v292_v50 = vpop.xlane.xlu1 %291 }
  0xea   : > { %v276_v51 = vpop.xlane.xlu0 %275 }
  0xed   : > { %v308_v52 = vpop.xlane.xlu1 %307 }
  0xee   : > { %v306_v53 = vpop.xlane.xlu0 %305  ;;  %v338_v62 = vadd.f32 %v308_v52, %v276_v51 }
  0xef   : > { %v337_v1 = vadd.f32 %v306_v53, %v274_v49 }
  0xf0   : > { %v466_v16 = vmul.f32 0.00390625, %v338_v62 }
  0xf1   : > { %v324_v54 = vpop.xlane.xlu1 %323  ;;  %v465_v17 = vmul.f32 0.00390625, %v337_v1 }
  0xf2   : > { %v322_v55 = vpop.xlane.xlu0 %321  ;;  %v346_v14 = vadd.f32 %v324_v54, %v292_v50  ;;  %v498_v41 = vmul.f32 %v466_v16, %v466_v16 }
  0xf3   : > { %v345_v15 = vadd.f32 %v322_v55, %v290_v48  ;;  %v497_v42 = vmul.f32 %v465_v17, %v465_v17 }
  0xf4   : > { %v1950_v30 = vmul.f32 0.00390625, %v346_v14 }
  0xf5   : > { %v372_v58 = vpop.xlane.xlu1 %371  ;;  %v1952_v37 = vmul.f32 0.00390625, %v345_v15 }
  0xf6   : > { %v370_v59 = vpop.xlane.xlu0 %369  ;;  %v506_v50 = vmul.f32 %v1950_v30, %v1950_v30 }
  0xf7   : > { %v505_v51 = vmul.f32 %v1952_v37, %v1952_v37 }
  0xf9   : > { %v388_v12 = vpop.xlane.xlu1 %387 }
  0xfa   : > { %v386_v13 = vpop.xlane.xlu0 %385 }
  0xfd   : > { %v420_v18 = vpop.xlane.xlu1 %419 }
  0xfe   : > { %v418_v19 = vpop.xlane.xlu0 %417  ;;  %v450_v20 = vadd.f32 %v420_v18, %v372_v58 }
  0xff   : > { %v449_v25 = vadd.f32 %v418_v19, %v370_v59 }
 0x100   : > { %v482_v40 = vmul.f32 0.00390625, %v450_v20 }
 0x101   : > { %v481_v43 = vmul.f32 0.00390625, %v449_v25  ;;  %v436_v44 = vpop.xlane.xlu1 %435 }
 0x102   : > { %v434_v45 = vpop.xlane.xlu0 %433  ;;  %v514_v46 = vsub.f32 %v482_v40, %v498_v41  ;;  %v458_v49 = vadd.f32 %v436_v44, %v388_v12 }
 0x103   : > { %v513_v47 = vsub.f32 %v481_v43, %v497_v42  ;;  %v457_v48 = vadd.f32 %v434_v45, %v386_v13  ;;  %v579_v42 = vsub.f32 %v1784_v5, %v466_v16  ;;  %v580_v45 = vsub.f32 %v1790_v8, %v466_v16 }
 0x104   : > { %v530_v52 = vmax.f32 %v514_v46, 0.0  ;;  %v490_v54 = vmul.f32 0.00390625, %v458_v49  ;;  %v578_v49 = vsub.f32 %v1792_v9, %v465_v17  ;;  %v593_v5 = vsub.f32 %v1776_v2, %v1952_v37 }
 0x105   : > { %v529_v53 = vmax.f32 %v513_v47, 0.0  ;;  %v489_v55 = vmul.f32 0.00390625, %v457_v48  ;;  %v280_v58 = vpop.xlane.xlu1 %279  ;;  %v577_v47 = vsub.f32 %v1778_v3, %v465_v17  ;;  %v594_v3 = vsub.f32 %v1798_v11, %v1952_v37 }
 0x106   : > { %v278_v59 = vpop.xlane.xlu0 %277  ;;  %v546_v62 = vadd.f32 1e-05, %v530_v52  ;;  %v522_v14 = vsub.f32 %v490_v54, %v506_v50  ;;  %v595_v54 = vsub.f32 %v1782_v4, %v1950_v30  ;;  %v596_v9 = vsub.f32 %v1796_v10, %v1950_v30 }
 0x107   : > { %v545_v1 = vadd.f32 1e-05, %v529_v53  ;;  %v521_v15 = vsub.f32 %v489_v55, %v505_v51 }
 0x108   : > { %1434 = vrsqrt.f32 %v546_v62  ;;  %v538_v18 = vmax.f32 %v522_v14, 0.0 }
 0x109   : > { %v537_v12 = vmax.f32 %v521_v15, 0.0  ;;  %1436 = vrsqrt.f32 %v545_v1  ;;  %v296_v13 = vpop.xlane.xlu1 %295 }
 0x10a   : > { %v294_v19 = vpop.xlane.xlu0 %293  ;;  %v554_v20 = vadd.f32 1e-05, %v538_v18 }
 0x10b   : > { %v553_v25 = vadd.f32 1e-05, %v537_v12 }
 0x10c   : > { %1438 = vrsqrt.f32 %v554_v20 }
 0x10d   : > { %1440 = vrsqrt.f32 %v553_v25  ;;  %v312_v40 = vpop.xlane.xlu1 %311 }
 0x10e   : > { %v310_v41 = vpop.xlane.xlu0 %309  ;;  %v340_v14 = vadd.f32 %v312_v40, %v280_v58 }
 0x10f   : > { %v339_v15 = vadd.f32 %v310_v41, %v278_v59 }
 0x111   : > { %v328_v43 = vpop.xlane.xlu1 %327  ;;  %v467_v11 = vmul.f32 0.00390625, %v339_v15 }
 0x112   : > { %v326_v44 = vpop.xlane.xlu0 %325  ;;  %v1435_v46 = vpop.eup %1434 }
 0x113   : > { %v1437_v48 = vpop.eup %1436  ;;  %v612_v50 = vmul.f32 %v1435_v46, %v580_v45  ;;  %v611_v51 = vmul.f32 %v1435_v46, %v579_v42  ;;  %v348_v46 = vadd.f32 %v328_v43, %v296_v13 }
 0x114   : > { %v610_v52 = vmul.f32 %v1437_v48, %v578_v49  ;;  %v609_v53 = vmul.f32 %v1437_v48, %v577_v47  ;;  %v347_v47 = vadd.f32 %v326_v44, %v294_v19  ;;  %v468_v49 = vmul.f32 0.00390625, %v340_v14 }
 0x115   : > { %v376_v55 = vpop.xlane.xlu1 %375  ;;  %v1970_v59 = vmul.f32 0.00390625, %v348_v46 }
 0x116   : > { %v374_v62 = vpop.xlane.xlu0 %373  ;;  %v1439_v1 = vpop.eup %1438  ;;  %v642_v8 = vpack.c.bf16 %v612_v50, %v610_v52  ;;  %v641_v16 = vpack.c.bf16 %v611_v51, %v609_v53  ;;  %v1972_v40 = vmul.f32 0.00390625, %v347_v47  ;;  %v500_v41 = vmul.f32 %v468_v49, %v468_v49 }
 0x117   : > { %v1441_v17 = vpop.eup %1440  ;;  %v628_v4 = vmul.f32 %v1439_v1, %v596_v9  ;;  %v627_v20 = vmul.f32 %v1439_v1, %v595_v54  ;;  %v499_v50 = vmul.f32 %v467_v11, %v467_v11  ;;  %v508_v54 = vmul.f32 %v1970_v59, %v1970_v59 }
 0x118   : > { %824 = vmatprep.mubr.bf16.mxu0 %v642_v8  ;;  %v626_v18 = vmul.f32 %v1441_v17, %v594_v3  ;;  %v625_v12 = vmul.f32 %v1441_v17, %v593_v5  ;;  %v507_v5 = vmul.f32 %v1972_v40, %v1972_v40  ;;  %v583_v46 = vsub.f32 %v1819_v21, %v468_v49 }
 0x119   : > { %825 = vmatmul.mubr.bf16.vlgmr.msra.gmra.mrb[0].mxu0 %v641_v16  ;;  %v392_v2 = vpop.xlane.xlu1 %391  ;;  %v584_v47 = vsub.f32 %v1833_v31, %v468_v49  ;;  %v600_v21 = vsub.f32 %v1840_v35, %v1970_v59 }
 0x11a   : > { %v390_v25 = vpop.xlane.xlu0 %389  ;;  %v650_v42 = vpack.c.bf16 %v628_v4, %v626_v18  ;;  %v649_v45 = vpack.c.bf16 %v627_v20, %v625_v12 }
 0x11c   : > { %856 = vmatprep.mubr.bf16.mxu1 %v650_v42 }
 0x11d   : > { %857 = vmatmul.mubr.bf16.vlgmr.msra.gmra.mrb[0].mxu1 %v649_v45  ;;  %v424_v10 = vpop.xlane.xlu1 %423 }
 0x11e   : > { %v422_v30 = vpop.xlane.xlu0 %421  ;;  %v452_v37 = vadd.f32 %v424_v10, %v376_v55 }
 0x11f   : > { %v451_v58 = vadd.f32 %v422_v30, %v374_v62 }
 0x120   : > { %v484_v48 = vmul.f32 0.00390625, %v452_v37 }
 0x121   : > { %v483_v51 = vmul.f32 0.00390625, %v451_v58  ;;  %v440_v52 = vpop.xlane.xlu1 %439  ;;  %v581_v58 = vsub.f32 %v1821_v22, %v467_v11  ;;  %v598_v22 = vsub.f32 %v1842_v36, %v1972_v40 }
 0x122   : > { %v438_v53 = vpop.xlane.xlu0 %437  ;;  %v516_v13 = vsub.f32 %v484_v48, %v500_v41  ;;  %v460_v43 = vadd.f32 %v440_v52, %v392_v2  ;;  %v582_v41 = vsub.f32 %v1835_v32, %v467_v11 }
 0x123   : > { %v515_v19 = vsub.f32 %v483_v51, %v499_v50  ;;  %v459_v44 = vadd.f32 %v438_v53, %v390_v25 }
 0x124   : > { %v532_v55 = vmax.f32 %v516_v13, 0.0  ;;  %v492_v1 = vmul.f32 0.00390625, %v460_v43  ;;  %v599_v13 = vsub.f32 %v1826_v26, %v1970_v59  ;;  %v597_v43 = vsub.f32 %v1828_v27, %v1972_v40 }
 0x125   : > { %v531_v62 = vmax.f32 %v515_v19, 0.0  ;;  %v491_v8 = vmul.f32 0.00390625, %v459_v44  ;;  %v284_v16 = vpop.xlane.xlu1 %283 }
 0x126   : > { %v282_v3 = vpop.xlane.xlu0 %281  ;;  %v548_v9 = vadd.f32 1e-05, %v532_v55  ;;  %v524_v14 = vsub.f32 %v492_v1, %v508_v54 }
 0x127   : > { %v547_v17 = vadd.f32 1e-05, %v531_v62  ;;  %v523_v15 = vsub.f32 %v491_v8, %v507_v5 }
 0x128   : > { %1442 = vrsqrt.f32 %v548_v9  ;;  %v540_v18 = vmax.f32 %v524_v14, 0.0 }
 0x129   : > { %v539_v4 = vmax.f32 %v523_v15, 0.0  ;;  %1444 = vrsqrt.f32 %v547_v17  ;;  %v300_v12 = vpop.xlane.xlu1 %299 }
 0x12a   : > { %v298_v20 = vpop.xlane.xlu0 %297  ;;  %v556_v2 = vadd.f32 1e-05, %v540_v18 }
 0x12b   : > { %v555_v25 = vadd.f32 1e-05, %v539_v4 }
 0x12c   : > { %1446 = vrsqrt.f32 %v556_v2 }
 0x12d   : > { %1448 = vrsqrt.f32 %v555_v25  ;;  %v316_v42 = vpop.xlane.xlu1 %315 }
 0x12e   : > { %v314_v45 = vpop.xlane.xlu0 %313  ;;  %v342_v54 = vadd.f32 %v316_v42, %v284_v16 }
 0x12f   : > { %v341_v5 = vadd.f32 %v314_v45, %v282_v3 }
 0x130   : > { %v470_v14 = vmul.f32 0.00390625, %v342_v54 }
 0x131   : > { %v332_v10 = vpop.xlane.xlu1 %331  ;;  %v469_v15 = vmul.f32 0.00390625, %v341_v5 }
 0x132   : > { %v330_v30 = vpop.xlane.xlu0 %329  ;;  %v1443_v37 = vpop.eup %1442  ;;  %v350_v17 = vadd.f32 %v332_v10, %v300_v12  ;;  %v502_v2 = vmul.f32 %v470_v14, %v470_v14 }
 0x133   : > { %v1445_v48 = vpop.eup %1444  ;;  %v616_v50 = vmul.f32 %v1443_v37, %v584_v47  ;;  %v615_v51 = vmul.f32 %v1443_v37, %v583_v46  ;;  %v349_v27 = vadd.f32 %v330_v30, %v298_v20  ;;  %v501_v42 = vmul.f32 %v469_v15, %v469_v15 }
 0x134   : > { %v614_v52 = vmul.f32 %v1445_v48, %v582_v41  ;;  %v613_v53 = vmul.f32 %v1445_v48, %v581_v58  ;;  %v1990_v18 = vmul.f32 0.00390625, %v350_v17 }
 0x135   : > { %v380_v19 = vpop.xlane.xlu1 %379  ;;  %v1992_v4 = vmul.f32 0.00390625, %v349_v27 }
 0x136   : > { %v378_v31 = vpop.xlane.xlu0 %377  ;;  %v1447_v49 = vpop.eup %1446  ;;  %v644_v32 = vpack.c.bf16 %v616_v50, %v614_v52  ;;  %v643_v11 = vpack.c.bf16 %v615_v51, %v613_v53  ;;  %v510_v37 = vmul.f32 %v1990_v18, %v1990_v18 }
 0x137   : > { %v1449_v44 = vpop.eup %1448  ;;  %v632_v26 = vmul.f32 %v1447_v49, %v600_v21  ;;  %v631_v1 = vmul.f32 %v1447_v49, %v599_v13  ;;  %v509_v58 = vmul.f32 %v1992_v4, %v1992_v4 }
 0x138   : > { %832 = vmatprep.mubr.bf16.mxu0 %v644_v32  ;;  %v630_v55 = vmul.f32 %v1449_v44, %v598_v22  ;;  %v629_v62 = vmul.f32 %v1449_v44, %v597_v43 }
 0x139   : > { %833 = vmatmul.mubr.bf16.gmra.mrb[4].mxu0 %v643_v11  ;;  %v396_v35 = vpop.xlane.xlu1 %395 }
 0x13a   : > { %v394_v59 = vpop.xlane.xlu0 %393  ;;  %v652_v8 = vpack.c.bf16 %v632_v26, %v630_v55  ;;  %v651_v9 = vpack.c.bf16 %v631_v1, %v629_v62  ;;  %v587_v55 = vsub.f32 %v1863_v56, %v470_v14  ;;  %v588_v26 = vsub.f32 %v1877_v63, %v470_v14 }
 0x13b   : > { %v604_v56 = vsub.f32 %v1884_v6, %v1990_v18 }
 0x13c   : > { %864 = vmatprep.mubr.bf16.mxu1 %v652_v8  ;;  %v586_v8 = vsub.f32 %v1879_v0, %v469_v15 }
 0x13d   : > { %865 = vmatmul.mubr.bf16.gmra.mrb[4].mxu1 %v651_v9  ;;  %v428_v36 = vpop.xlane.xlu1 %427 }
 0x13e   : > { %v426_v40 = vpop.xlane.xlu0 %425  ;;  %v454_v16 = vadd.f32 %v428_v36, %v380_v19 }
 0x13f   : > { %v453_v3 = vadd.f32 %v426_v40, %v378_v31 }
 0x140   : > { %v486_v25 = vmul.f32 0.00390625, %v454_v16  ;;  %v603_v16 = vsub.f32 %v1870_v60, %v1990_v18 }
 0x141   : > { %v485_v45 = vmul.f32 0.00390625, %v453_v3  ;;  %v444_v46 = vpop.xlane.xlu1 %443 }
 0x142   : > { %v442_v47 = vpop.xlane.xlu0 %441  ;;  %v518_v12 = vsub.f32 %v486_v25, %v502_v2  ;;  %v462_v10 = vadd.f32 %v444_v46, %v396_v35  ;;  %v601_v2 = vsub.f32 %v1872_v61, %v1992_v4 }
 0x143   : > { %v517_v20 = vsub.f32 %v485_v45, %v501_v42  ;;  %v461_v30 = vadd.f32 %v442_v47, %v394_v59  ;;  %v585_v59 = vsub.f32 %v1865_v57, %v469_v15  ;;  %v602_v57 = vsub.f32 %v1886_v7, %v1992_v4 }
 0x144   : > { %v534_v41 = vmax.f32 %v518_v12, 0.0  ;;  %v494_v50 = vmul.f32 0.00390625, %v462_v10 }
 0x145   : > { %v533_v48 = vmax.f32 %v517_v20, 0.0  ;;  %v493_v51 = vmul.f32 0.00390625, %v461_v30  ;;  %v288_v52 = vpop.xlane.xlu1 %287 }
 0x146   : > { %v286_v53 = vpop.xlane.xlu0 %285  ;;  %v550_v13 = vadd.f32 1e-05, %v534_v41  ;;  %v526_v19 = vsub.f32 %v494_v50, %v510_v37 }
 0x147   : > { %v549_v21 = vadd.f32 1e-05, %v533_v48  ;;  %v525_v31 = vsub.f32 %v493_v51, %v509_v58 }
 0x148   : > { %1450 = vrsqrt.f32 %v550_v13  ;;  %v542_v49 = vmax.f32 %v526_v19, 0.0 }
 0x149   : > { %v541_v43 = vmax.f32 %v525_v31, 0.0  ;;  %1452 = vrsqrt.f32 %v549_v21  ;;  %v304_v22 = vpop.xlane.xlu1 %303 }
 0x14a   : > { %v302_v32 = vpop.xlane.xlu0 %301  ;;  %v558_v11 = vadd.f32 1e-05, %v542_v49 }
 0x14b   : > { %v557_v44 = vadd.f32 1e-05, %v541_v43 }
 0x14c   : > { %1454 = vrsqrt.f32 %v558_v11 }
 0x14d   : > { %1456 = vrsqrt.f32 %v557_v44  ;;  %v320_v54 = vpop.xlane.xlu1 %319 }
 0x14e   : > { %v318_v5 = vpop.xlane.xlu0 %317  ;;  %v344_v42 = vadd.f32 %v320_v54, %v288_v52 }
 0x14f   : > { %v343_v45 = vadd.f32 %v318_v5, %v286_v53 }
 0x150   : > { %v472_v37 = vmul.f32 0.00390625, %v344_v42 }
 0x151   : > { %v336_v62 = vpop.xlane.xlu1 %335  ;;  %v471_v58 = vmul.f32 0.00390625, %v343_v45 }
 0x152   : > { %v334_v1 = vpop.xlane.xlu0 %333  ;;  %v1451_v35 = vpop.eup %1450  ;;  %v352_v30 = vadd.f32 %v336_v62, %v304_v22  ;;  %v504_v52 = vmul.f32 %v472_v37, %v472_v37 }
 0x153   : > { %v1453_v9 = vpop.eup %1452  ;;  %v620_v17 = vmul.f32 %v1451_v35, %v588_v26  ;;  %v619_v27 = vmul.f32 %v1451_v35, %v587_v55  ;;  %v351_v61 = vadd.f32 %v334_v1, %v302_v32  ;;  %v503_v13 = vmul.f32 %v471_v58, %v471_v58 }
 0x154   : > { %v618_v36 = vmul.f32 %v1453_v9, %v586_v8  ;;  %v617_v40 = vmul.f32 %v1453_v9, %v585_v59  ;;  %v480_v50 = vmul.f32 0.00390625, %v352_v30 }
 0x155   : > { %v384_v3 = vpop.xlane.xlu1 %383  ;;  %v479_v51 = vmul.f32 0.00390625, %v351_v61 }
 0x156   : > { %v382_v63 = vpop.xlane.xlu0 %381  ;;  %v1455_v14 = vpop.eup %1454  ;;  %v646_v0 = vpack.c.bf16 %v620_v17, %v618_v36  ;;  %v645_v15 = vpack.c.bf16 %v619_v27, %v617_v40  ;;  %v512_v11 = vmul.f32 %v480_v50, %v480_v50  ;;  %v591_v36 = vsub.f32 %v1907_v23, %v472_v37 }
 0x157   : > { %v1457_v25 = vpop.eup %1456  ;;  %v636_v60 = vmul.f32 %v1455_v14, %v604_v56  ;;  %v635_v12 = vmul.f32 %v1455_v14, %v603_v16  ;;  %v511_v44 = vmul.f32 %v479_v51, %v479_v51  ;;  %v592_v40 = vsub.f32 %v1921_v33, %v472_v37 }
 0x158   : > { %840 = vmatprep.mubr.bf16.mxu0 %v646_v0  ;;  %v634_v46 = vmul.f32 %v1457_v25, %v602_v57  ;;  %v633_v47 = vmul.f32 %v1457_v25, %v601_v2  ;;  %v589_v56 = vsub.f32 %v1909_v24, %v471_v58  ;;  %v608_v25 = vsub.f32 %v1928_v38, %v480_v50 }
 0x159   : > { %841 = vmatmul.mubr.bf16.gmra.mrb[8].mxu0 %v645_v15  ;;  %v400_v6 = vpop.xlane.xlu1 %399  ;;  %v607_v15 = vsub.f32 %v1914_v28, %v480_v50  ;;  %v605_v45 = vsub.f32 %v1916_v29, %v479_v51  ;;  %v606_v23 = vsub.f32 %v1930_v39, %v479_v51  ;;  %v2021_v39 = vld [vmem:[%s2102_s2] ss:$0 sm:$0xff] }
 0x15a   : > { %v398_v18 = vpop.xlane.xlu0 %397  ;;  %v654_v20 = vpack.c.bf16 %v636_v60, %v634_v46  ;;  %v653_v10 = vpack.c.bf16 %v635_v12, %v633_v47 }
 0x15c   : > { %872 = vmatprep.mubr.bf16.mxu1 %v654_v20 }
 0x15d   : > { %873 = vmatmul.mubr.bf16.gmra.mrb[8].mxu1 %v653_v10  ;;  %v432_v7 = vpop.xlane.xlu1 %431 }
 0x15e   : > { %v430_v4 = vpop.xlane.xlu0 %429  ;;  %v456_v41 = vadd.f32 %v432_v7, %v384_v3  ;;  %v590_v3 = vsub.f32 %v1923_v34, %v471_v58 }
 0x15f   : > { %v455_v48 = vadd.f32 %v430_v4, %v382_v63 }
 0x160   : > { %v488_v53 = vmul.f32 0.00390625, %v456_v41 }
 0x161   : > { %v487_v21 = vmul.f32 0.00390625, %v455_v48  ;;  %v448_v19 = vpop.xlane.xlu1 %447 }
 0x162   : > { %v446_v31 = vpop.xlane.xlu0 %445  ;;  %v520_v49 = vsub.f32 %v488_v53, %v504_v52  ;;  %v464_v22 = vadd.f32 %v448_v19, %v400_v6 }
 0x163   : > { %v519_v43 = vsub.f32 %v487_v21, %v503_v13  ;;  %v463_v32 = vadd.f32 %v446_v31, %v398_v18 }
 0x164   : > { %v536_v54 = vmax.f32 %v520_v49, 0.0  ;;  %v496_v55 = vmul.f32 0.00390625, %v464_v22 }
 0x165   : > { %v535_v5 = vmax.f32 %v519_v43, 0.0  ;;  %v495_v26 = vmul.f32 0.00390625, %v463_v32 }
 0x166   : > { %v552_v62 = vadd.f32 1e-05, %v536_v54  ;;  %v528_v35 = vsub.f32 %v496_v55, %v512_v11 }
 0x167   : > { %v551_v1 = vadd.f32 1e-05, %v535_v5  ;;  %v527_v59 = vsub.f32 %v495_v26, %v511_v44 }
 0x168   : > { %1458 = vrsqrt.f32 %v552_v62  ;;  %v544_v8 = vmax.f32 %v528_v35, 0.0 }
 0x169   : > { %v543_v9 = vmax.f32 %v527_v59, 0.0  ;;  %1460 = vrsqrt.f32 %v551_v1 }
 0x16a   : > { %v560_v17 = vadd.f32 1e-05, %v544_v8 }
 0x16b   : > { %v559_v27 = vadd.f32 1e-05, %v543_v9 }
 0x16c   : > { %1462 = vrsqrt.f32 %v560_v17 }
 0x16d   : > { %1464 = vrsqrt.f32 %v559_v27 }
 0x172   : > { %v1459_v16 = vpop.eup %1458 }
 0x173   : > { %v1461_v63 = vpop.eup %1460  ;;  %v624_v14 = vmul.f32 %v1459_v16, %v592_v40  ;;  %v623_v2 = vmul.f32 %v1459_v16, %v591_v36 }
 0x174   : > { %v622_v57 = vmul.f32 %v1461_v63, %v590_v3  ;;  %v621_v0 = vmul.f32 %v1461_v63, %v589_v56 }
 0x176   : > { %v1463_v42 = vpop.eup %1462  ;;  %v648_v33 = vpack.c.bf16 %v624_v14, %v622_v57  ;;  %v647_v46 = vpack.c.bf16 %v623_v2, %v621_v0 }
 0x177   : > { %v1465_v60 = vpop.eup %1464  ;;  %v640_v24 = vmul.f32 %v1463_v42, %v608_v25  ;;  %v639_v34 = vmul.f32 %v1463_v42, %v607_v15 }
 0x178   : > { %848 = vmatprep.mubr.bf16.mxu0 %v648_v33  ;;  %v638_v47 = vmul.f32 %v1465_v60, %v606_v23  ;;  %v637_v12 = vmul.f32 %v1465_v60, %v605_v45 }
 0x179   : > { %849 = vmatmul.mubr.bf16.gmra.mrb[12].mxu0 %v647_v46 }
 0x17a   : > { %v656_v6 = vpack.c.bf16 %v640_v24, %v638_v47  ;;  %v655_v18 = vpack.c.bf16 %v639_v34, %v637_v12 }
 0x17c   : > { %880 = vmatprep.mubr.bf16.mxu1 %v656_v6 }
 0x17d   : > { %881 = vmatmul.mubr.bf16.gmra.mrb[12].mxu1 %v655_v18 }
 0x1ec   : > { %v1293_v28 = vpop.f32.mrb[0].mxu0 }
 0x1ed   : > { %v1294_v38 = vpop.f32.mrb[1].mxu0 }
 0x1ee   : > { %v1295_v20 = vadd.f32 %v1294_v38, %v1293_v28  ;;  %v1296_v29 = vpop.f32.mrb[2].mxu0 }
 0x1ef   : > { %v1297_v10 = vpop.f32.mrb[3].mxu0 }
 0x1f0   : > { %v1298_v30 = vadd.f32 %v1297_v10, %v1296_v29  ;;  %v1317_v61 = vpop.f32.mrb[0].mxu1  ;;  %v827_v58 = vadd.f32 %v1295_v20, %v2021_v39 }
 0x1f1   : > { %v1318_v37 = vpop.f32.mrb[1].mxu1 }
 0x1f2   : > { %v830_v7 = vadd.f32 %v1298_v30, %v2021_v39  ;;  %v1319_v4 = vadd.f32 %v1318_v37, %v1317_v61  ;;  %v1320_v41 = vpop.f32.mrb[2].mxu1 }
 0x1f3   : > { %v1321_v48 = vpop.f32.mrb[3].mxu1 }
 0x1f4   : > { %v1218_v50 = vpack.c.bf16 %v830_v7, %v827_v58  ;;  %v1322_v51 = vadd.f32 %v1321_v48, %v1320_v41  ;;  %v859_v52 = vadd.f32 %v1319_v4, %v2021_v39 }
 0x1f6   : > { %1219 = vst [vmem:[%s2026_s9] sm:$0xff] %v1218_v50   ;;  %v862_v53 = vadd.f32 %v1322_v51, %v2021_v39 }
 0x1f8   : > { %v1238_v13 = vpack.c.bf16 %v862_v53, %v859_v52 }
 0x1fa   : > { %1273 = vst [vmem:[%s2026_s9 + $0x20] sm:$0xff] %v1238_v13  }
 0x20c   : > { %v1299_v21 = vpop.f32.mrb[4].mxu0 }
 0x20d   : > { %v1300_v19 = vpop.f32.mrb[5].mxu0 }
 0x20e   : > { %v1301_v31 = vadd.f32 %v1300_v19, %v1299_v21  ;;  %v1302_v49 = vpop.f32.mrb[6].mxu0 }
 0x20f   : > { %v1303_v43 = vpop.f32.mrb[7].mxu0 }
 0x210   : > { %v1304_v22 = vadd.f32 %v1303_v43, %v1302_v49  ;;  %v1323_v32 = vpop.f32.mrb[4].mxu1  ;;  %v835_v44 = vadd.f32 %v1301_v31, %v2021_v39 }
 0x211   : > { %v1324_v11 = vpop.f32.mrb[5].mxu1 }
 0x212   : > { %v838_v54 = vadd.f32 %v1304_v22, %v2021_v39  ;;  %v1325_v5 = vadd.f32 %v1324_v11, %v1323_v32  ;;  %v1326_v55 = vpop.f32.mrb[6].mxu1 }
 0x213   : > { %v1327_v26 = vpop.f32.mrb[7].mxu1 }
 0x214   : > { %v1223_v62 = vpack.c.bf16 %v838_v54, %v835_v44  ;;  %v1328_v1 = vadd.f32 %v1327_v26, %v1326_v55  ;;  %v867_v35 = vadd.f32 %v1325_v5, %v2021_v39 }
 0x216   : > { %1270 = vst [vmem:[%s2026_s9 + $0x8] sm:$0xff] %v1223_v62   ;;  %v870_v59 = vadd.f32 %v1328_v1, %v2021_v39 }
 0x218   : > { %v1243_v8 = vpack.c.bf16 %v870_v59, %v867_v35 }
 0x21a   : > { %1274 = vst [vmem:[%s2026_s9 + $0x28] sm:$0xff] %v1243_v8  }
 0x22c   : > { %v1305_v9 = vpop.f32.mrb[8].mxu0 }
 0x22d   : > { %v1306_v17 = vpop.f32.mrb[9].mxu0 }
 0x22e   : > { %v1307_v27 = vadd.f32 %v1306_v17, %v1305_v9  ;;  %v1308_v36 = vpop.f32.mrb[10].mxu0 }
 0x22f   : > { %v1309_v40 = vpop.f32.mrb[11].mxu0 }
 0x230   : > { %v1310_v16 = vadd.f32 %v1309_v40, %v1308_v36  ;;  %v1329_v56 = vpop.f32.mrb[8].mxu1  ;;  %v843_v63 = vadd.f32 %v1307_v27, %v2021_v39 }
 0x231   : > { %v1330_v3 = vpop.f32.mrb[9].mxu1 }
 0x232   : > { %v846_v14 = vadd.f32 %v1310_v16, %v2021_v39  ;;  %v1331_v2 = vadd.f32 %v1330_v3, %v1329_v56  ;;  %v1332_v57 = vpop.f32.mrb[10].mxu1 }
 0x233   : > { %v1333_v0 = vpop.f32.mrb[11].mxu1 }
 0x234   : > { %v1228_v15 = vpack.c.bf16 %v846_v14, %v843_v63  ;;  %v1334_v25 = vadd.f32 %v1333_v0, %v1332_v57  ;;  %v875_v42 = vadd.f32 %v1331_v2, %v2021_v39 }
 0x236   : > { %1271 = vst [vmem:[%s2026_s9 + $0x10] sm:$0xff] %v1228_v15   ;;  %v878_v45 = vadd.f32 %v1334_v25, %v2021_v39 }
 0x238   : > { %v1248_v23 = vpack.c.bf16 %v878_v45, %v875_v42 }
 0x23a   : > { %1275 = vst [vmem:[%s2026_s9 + $0x30] sm:$0xff] %v1248_v23  }
 0x24c   : > { %v1311_v33 = vpop.f32.mrb[12].mxu0 }
 0x24d   : > { %v1312_v46 = vpop.f32.mrb[13].mxu0 }
 0x24e   : > { %v1313_v60 = vadd.f32 %v1312_v46, %v1311_v33  ;;  %v1314_v24 = vpop.f32.mrb[14].mxu0 }
 0x24f   : > { %v1315_v34 = vpop.f32.mrb[15].mxu0 }
 0x250   : > { %v1316_v47 = vadd.f32 %v1315_v34, %v1314_v24  ;;  %v1335_v12 = vpop.f32.mrb[12].mxu1  ;;  %v851_v18 = vadd.f32 %v1313_v60, %v2021_v39 }
 0x251   : > { %v1336_v6 = vpop.f32.mrb[13].mxu1 }
 0x252   : > { %v854_v28 = vadd.f32 %v1316_v47, %v2021_v39  ;;  %v1337_v38 = vadd.f32 %v1336_v6, %v1335_v12  ;;  %v1338_v20 = vpop.f32.mrb[14].mxu1 }
 0x253   : > { %v1339_v29 = vpop.f32.mrb[15].mxu1 }
 0x254   : > { %v1233_v10 = vpack.c.bf16 %v854_v28, %v851_v18  ;;  %v1340_v30 = vadd.f32 %v1339_v29, %v1338_v20  ;;  %v883_v61 = vadd.f32 %v1337_v38, %v2021_v39 }
 0x256   : > { %1272 = vst [vmem:[%s2026_s9 + $0x18] sm:$0xff] %v1233_v10   ;;  %v886_v37 = vadd.f32 %v1340_v30, %v2021_v39 }
 0x258   : > { %v1253_v58 = vpack.c.bf16 %v886_v37, %v883_v61 }
 0x25a   : > { %1276 = vst [vmem:[%s2026_s9 + $0x38] sm:$0xff] %v1253_v58  }
 0x25b   : > { %1537 = shalt.err (!%p1534_p7)
}
 0x25c   : > { %s1538_s22 = scalar_lea.hbm %s2054_s27, 1024  ;;  %s1542_s11 = scalar_lea.hbm %s2103_s3, 4096 }
 0x25d   : > { %p1539_p9 = scmp.ne.s32.totalorder %s2054_s27, %s1538_s22  ;;  %p1543_p5 = scmp.lt.u32.totalorder %s2054_s27, %s2103_s3 }
 0x25e   : > { %p1544_p10 = scmp.lt.u32.totalorder %s1542_s11, %s1538_s22  ;;  %p1546_p4 = scmp.lt.u32.totalorder %s1538_s22, %s2054_s27 }
 0x25f   : > { %p1540_p1 = pnand %p1539_p9, %p1709_p12 }
 0x260   : > { %p1545_p2 = por %p1544_p10, %p1543_p5 }
 0x261   : > { %p1541_p0 = pneg %p1540_p1 }
 0x262   : > { %p1547_p6 = por %p1546_p4, %p1545_p2 }
 0x264   : > { %p1548_p8 = pnand %p1547_p6, %p1541_p0 }
 0x266   : > { %1551 = shalt.err (!%p1548_p8)
}
 0x267   : > { %s1601_s8 = smov 64   ;;  %s1602_s9 = smov 4  }
 0x268   : > { %1363 = dma.vmem_to_hbm [thread:$0]  (%p1709_p12), %s2056_s25, 1024, %s2054_s27, %s970_s28, %s1601_s8, %s1601_s8, %s1602_s9  }
 0x269 PF: > { %p1380_p11 = scmp.ge.s32.totalorder %s1594_s15, 2  ;;  %s998_s4 = sand.u32 1, %s1582_s12  }
 0x26a   : > { %p2118_p13 = scmp.ne.s32.totalorder %s2108_s19, 0  ;;  %s999_s26 = scalar_lea.sflag [#allocation4], %s998_s4 }
 0x26c   : > { %p1374_p3 = pnand %p1380_p11, %p2118_p13 }
 0x26e   : > { %1577 = dma.done.wait (!%p1374_p3), %s999_s26, 1024  }
 0x26f   : > { %1579 = vsyncadd (!%p1374_p3), %s999_s26, 4294966272  ;;  %p17_p7 = scmp.ge.s32.totalorder %s1676_s24, 6   ;;  %s2119_s12 = smov %s1586_s13 }
 0x270   : > { %s2120_s13 = smov %s1590_s14  ;;  %s2121_s14 = smov %s1705_s17 }
 0x271   : > { %s2122_s15 = smov %s1676_s24  ;;  %19 = sbr.rel (!%p17_p7) target bundleno = 6 (0x6), region = 82 }
 0x278   :  { %1004 = vsyncpa [#allocation3], 1 }
 0x279   :  { %1006 = vsyncpa [#allocation3 + $0x1], 1 }
 0x27a   :  { %1007 = vsyncpa [#allocation6], 1 }
 0x27b   :  { %1008 = vsyncpa [#allocation4], 1 }
 0x27c   :  { %1010 = vsyncpa [#allocation4 + $0x1], 1 }

// kernel: tpu_custom_call.1
= control target key start
LH: loop header
LB: loop body
LE: loop exit
PB: predicated region body
PF: predicated region fallthrough
CT: control target
= control target key end

     0   :  { %8 = vsyncpa [#allocation3], 0  ;;  %s2100_s0 = inlined_call_operand.hbm [shape: bf16[32,2,16,128], index: 0, kind: input, shape index: {}]   ;;  %s2101_s1 = inlined_call_operand.hbm [shape: bf16[256,128], index: 1, kind: input, shape index: {}]   ;;  %s2102_s2 = inlined_call_operand.vmem [shape: f32[1,128], index: 2, kind: input, shape index: {}]   ;;  %s2103_s3 = inlined_call_operand.hbm [shape: bf16[512,128], index: 3, kind: output, shape index: {}]  }
   0x1   :  { %10 = vsyncpa [#allocation3 + $0x1], 0 }
   0x2   :  { %11 = vsyncpa [#allocation6], 0 }
   0x3   :  { %12 = vsyncpa [#allocation4], 0 }
   0x4   :  { %14 = vsyncpa [#allocation4 + $0x1], 0  ;;  %s1623_s12 = smov 0   ;;  %s1625_s13 = smov 0  }
   0x5   :  { %s1627_s14 = smov 0   ;;  %s1629_s15 = smov 0  }
   0x6 LB: > { %s1644_s16 = sadd.s32 4294967295, %s1594_s15   ;;  %s1066_s17 = sadd.s32 4294967294, %s1594_s15   ;;  %s1594_s15 = sphi %s1629_s15, %s2122_s15   ;;  %s1590_s14 = sphi %s1627_s14, %s2121_s14   ;;  %s1586_s13 = sphi %s1625_s13, %s2120_s13   ;;  %s1582_s12 = sphi %s1623_s12, %s2119_s12  }
   0x7   : > { %p40_p0 = scmp.ne.s32.totalorder %s1586_s13, %s1582_s12  ;;  %p2104_p1 = scmp.eq.s32.totalorder %s1644_s16, 0 }
   0x8   : > { %p112_p3 = scmp.eq.s32.totalorder %s1066_s17, 3  ;;  %p1067_p5 = scmp.ge.s32.totalorder %s1594_s15, 1 }
   0x9   : > { %p1653_p4 = por %p2104_p1, %p40_p0  ;;  %p119_p7 = scmp.lt.s32.totalorder %s1594_s15, 5 }
   0xa   : > { %p1658_p6 = por %p112_p3, %p40_p0  ;;  %s1596_s21 = smov [#allocation5]  }
   0xb   : > { %s2107_s18 = scalar_select %p1653_p4, 1, 0 }
   0xc   : > { %s2108_s19 = scalar_select %p1658_p6, 1, 0 }
   0xd   : > { %p1663_p8 = pnand %p1067_p5, %p119_p7  ;;  %s131_s22 = sshll.u32 %s1596_s21, 4  ;;  %s132_s22 = int_to_ptr.vmem [resolvable:$true] %s131_s22 }
   0xe   : > { %s1676_s24 = sadd.s32 1, %s1594_s15   ;;  %s27_s25 = sadd.s32 1, %s1590_s14 }
   0xf   : > { %s2109_s20 = scalar_select %p1663_p8, 1, 0 }
  0x10   : > { %p1365_p9 = pneg %p1663_p8  ;;  %s24_s26 = ssub.s32 %s1594_s15, %s1676_s24 }
  0x11   : > { %s1466_s29 = scalar_lea.hbm %s2101_s1, 2048 }
  0x12   : > { %p1671_p10 = pnand %p1365_p9, %p2104_p1  ;;  %p1467_p11 = scmp.ne.s32.totalorder %s2101_s1, %s1466_s29 }
  0x13   : > { %p1473_p3 = scmp.lt.u32.totalorder %s1466_s29, %s2101_s1 }
  0x14   : > { %p1468_p12 = pneg %p1671_p10 }
  0x16   : > { %p1469_p13 = pnand %p1468_p12, %p1467_p11 }
  0x18   : > { %p1470_p0 = pneg %p1469_p13 }
  0x1a   : > { %p1475_p5 = pnand %p1473_p3, %p1470_p0 }
  0x1c   : > { %1478 = shalt.err (!%p1475_p5)
}
  0x1d   : > { %s1479_s7 = scalar_lea.vmem %s132_s22, 2048  ;;  %p1487_p2 = scmp.lt.s32.totalorder %s132_s22, %s132_s22 }
  0x1e   : > { %p1480_p7 = scmp.ne.s32.totalorder %s132_s22, %s1479_s7  ;;  %p1488_p6 = scmp.lt.s32.totalorder %s1479_s7, %s1479_s7 }
  0x20   : > { %p1482_p9 = pnand %p1480_p7, %p1468_p12  ;;  %p1489_p4 = por %p1488_p6, %p1487_p2 }
  0x22   : > { %p1483_p1 = pneg %p1482_p9 }
  0x24   : > { %p1490_p8 = pnand %p1489_p4, %p1483_p1 }
  0x26   : > { %1493 = shalt.err (!%p1490_p8)
}
  0x27   : > { %s1597_s8 = smov 64   ;;  %s1598_s9 = smov 4  }
  0x28   : > { %1368 = dma.hbm_to_vmem [thread:$0]  (!%p1671_p10), %s2101_s1, 2048, %s132_s22, [#allocation6], %s1597_s8, %s1597_s8, %s1598_s9  }
  0x29   : > { %p25_p1 = scmp.eq.s32.totalorder %s24_s26, 0  ;;  %p34_p2 = scmp.ne.s32.totalorder %s1590_s14, %s1586_s13 }
  0x2a   : > { %p35_p4 = scmp.eq.s32.totalorder %s1594_s15, 0  ;;  %p1378_p6 = scmp.lt.s32.totalorder %s1594_s15, 4 }
  0x2b   : > { %s1705_s17 = scalar_select %p25_p1, %s1590_s14, %s27_s25  }
  0x2c   : > { %p36_p8 = por %p35_p4, %p34_p2  ;;  %p2111_p11 = scmp.eq.s32.totalorder %s1644_s16, 3 }
  0x2d   : > { %s148_s23 = sand.u32 1, %s1590_s14   ;;  %s1133_s27 = sshll.u32 %s1594_s15, 11 }
  0x2e   : > { %p1709_p12 = por %p2111_p11, %p34_p2  ;;  %s1070_s28 = sshll.u32 %s148_s23, 7 }
  0x2f   : > { %s1718_s4 = scalar_lea.hbm %s2100_s0, %s1133_s27  ;;  %s152_s22 = scalar_lea.vmem [#allocation2], %s1070_s28 }
  0x30   : > { %s160_s25 = sshll.u32 %s152_s22, 4  ;;  %p1720_p10 = pnand %p1378_p6, %p36_p8  ;;  %s1724_s25 = int_to_ptr.vmem [resolvable:$true] %s160_s25 }
  0x31   : > { %s1726_s5 = scalar_lea.sflag [#allocation3], %s148_s23  ;;  %s1494_s6 = scalar_lea.hbm %s1718_s4, 2048 }
  0x32   : > { %p1495_p13 = scmp.ne.s32.totalorder %s1718_s4, %s1494_s6  ;;  %p1496_p0 = pneg %p1720_p10 }
  0x33   : > { %s1499_s11 = scalar_lea.hbm %s2100_s0, 8192  ;;  %p1500_p7 = scmp.lt.u32.totalorder %s1718_s4, %s2100_s0 }
  0x34   : > { %p1497_p3 = pnand %p1496_p0, %p1495_p13  ;;  %p1501_p9 = scmp.lt.u32.totalorder %s1499_s11, %s1494_s6 }
  0x35   : > { %p1503_p2 = scmp.lt.u32.totalorder %s1494_s6, %s1718_s4 }
  0x36   : > { %p1498_p5 = pneg %p1497_p3  ;;  %p1502_p1 = por %p1501_p9, %p1500_p7 }
  0x38   : > { %p1504_p4 = por %p1503_p2, %p1502_p1 }
  0x3a   : > { %p1505_p6 = pnand %p1504_p4, %p1498_p5 }
  0x3c   : > { %1508 = shalt.err (!%p1505_p6)
}
  0x3d   : > { %s1509_s23 = scalar_lea.vmem %s1724_s25, 2048  ;;  %s1599_s29 = smov [#allocation2]  }
  0x3e   : > { %p1510_p8 = scmp.ne.s32.totalorder %s1724_s25, %s1509_s23  ;;  %s1514_s30 = sshll.u32 %s1599_s29, 4  ;;  %s1515_s30 = int_to_ptr.vmem [resolvable:$false] %s1514_s30 }
  0x3f   : > { %s1516_s22 = scalar_lea.vmem %s1515_s30, 4096  ;;  %p1517_p3 = scmp.lt.s32.totalorder %s1724_s25, %s1515_s30 }
  0x40   : > { %p1512_p11 = pnand %p1510_p8, %p1496_p0  ;;  %p1518_p7 = scmp.lt.s32.totalorder %s1516_s22, %s1509_s23 }
  0x42   : > { %p1513_p13 = pneg %p1512_p11  ;;  %p1519_p9 = por %p1518_p7, %p1517_p3 }
  0x44   : > { %p1520_p1 = pnand %p1519_p9, %p1513_p13 }
  0x46   : > { %1523 = shalt.err (!%p1520_p1)
}
  0x47   : > { %1372 = dma.hbm_to_vmem [thread:$0]  (!%p1720_p10), %s1718_s4, 2048, %s1724_s25, %s1726_s5, %s1597_s8, %s1597_s8, %s1598_s9  }
  0x48   : > { %p2114_p0 = scmp.ne.s32.totalorder %s2109_s20, 0 }
  0x49   : > { %s1760_s6 = sand.u32 (!%p2114_p0), 1, %s1586_s13   ;;  %p2115_p5 = scmp.ne.s32.totalorder (!%p2114_p0), %s2107_s18, 0 }
  0x4a   : > { %172 = sbr.rel (%p2114_p0) target bundleno = 617 (0x269), region = 32  ;;  %s1075_s7 = sshll.u32 (!%p2114_p0), %s1760_s6, 7 }
  0x4b   : > { %s175_s10 = scalar_lea.sflag (!%p2114_p0), [#allocation3], %s1760_s6  ;;  %s1764_s11 = scalar_lea.vmem (!%p2114_p0), [#allocation2], %s1075_s7 }
  0x51   : > { %1569 = dma.done.wait (%p2115_p5), %s175_s10, 2048  }
  0x52   : > { %1571 = vsyncadd (%p2115_p5), %s175_s10, 4294965248  ;;  %p2116_p10 = scmp.eq.s32.totalorder %s1644_s16, 0 }
  0x54   : > { %1573 = dma.done.wait (%p2116_p10), [#allocation6], 2048   ;;  %p2117_p2 = pmov %p2116_p10 }
  0x55   : > { %v1258_v0 = vld [vmem:[%s1764_s11 + $0x40] sm:$0xff]   ;;  %v1262_v6 = vld [vmem:[%s1764_s11 + $0x8] sm:$0xff]   ;;  %v1255_v20 = vld [vmem:[%s1764_s11 + $0x10] sm:$0xff]   ;;  %s1077_s8 = sshll.u32 %s1760_s6, 6  ;;  %s1150_s4 = sshll.u32 %s1644_s16, 10 }
  0x56   : > { %1575 = vsyncadd (%p2117_p2), [#allocation6], 4294965248  ;;  %v1152_v1 = vld [vmem:[%s1764_s11] sm:$0xff]   ;;  %v1776_v2 = vunpack.c.l.bf16 %v1258_v0  ;;  %v1782_v4 = vunpack.c.h.bf16 %v1258_v0  ;;  %v1266_v7 = vld [vmem:[%s1764_s11 + $0x48] sm:$0xff]   ;;  %v1790_v8 = vunpack.c.h.bf16 %v1262_v6  ;;  %v1792_v9 = vunpack.c.l.bf16 %v1262_v6  ;;  %s2026_s9 = scalar_lea.vmem [#allocation7], %s1077_s8  ;;  %s2054_s27 = scalar_lea.hbm %s2103_s3, %s1150_s4 }
  0x57   : > { %v1778_v3 = vunpack.c.l.bf16 %v1152_v1  ;;  %v1784_v5 = vunpack.c.h.bf16 %v1152_v1  ;;  %v1796_v10 = vunpack.c.h.bf16 %v1266_v7  ;;  %v1798_v11 = vunpack.c.l.bf16 %v1266_v7  ;;  %v1259_v23 = vld [vmem:[%s1764_s11 + $0x50] sm:$0xff]   ;;  %v1418_v24 = vld [vmem:[#allocation5 + $0x40] sm:$0xff]   ;;  %v1263_v28 = vld [vmem:[%s1764_s11 + $0x18] sm:$0xff]   ;;  %s983_s25 = sshll.u32 %s2026_s9, 4  ;;  %s970_s28 = scalar_lea.sflag [#allocation4], %s1760_s6  ;;  %s2056_s25 = int_to_ptr.vmem [resolvable:$true] %s983_s25 }
  0x58   : > { %289 = vadd.xlane.f32.xlu1 %v1776_v2  ;;  %v362_v14 = vmul.f32 %v1782_v4, %v1782_v4  ;;  %v361_v15 = vmul.f32 %v1776_v2, %v1776_v2  ;;  %v402_v16 = vmul.f32 %v1790_v8, %v1790_v8  ;;  %v401_v17 = vmul.f32 %v1792_v9, %v1792_v9  ;;  %v1419_v25 = vld [vmem:[#allocation5] sm:$0xff]   ;;  %v1420_v29 = vld [vmem:[#allocation5 + $0x48] sm:$0xff]   ;;  %v1267_v33 = vld [vmem:[%s1764_s11 + $0x58] sm:$0xff]   ;;  %s1524_s16 = scalar_lea.vmem %s2056_s25, 1024  ;;  %s1600_s23 = smov [#allocation7]  }
  0x59   : > { %273 = vadd.xlane.f32.xlu0 %v1778_v3  ;;  %v354_v12 = vmul.f32 %v1784_v5, %v1784_v5  ;;  %v353_v13 = vmul.f32 %v1778_v3, %v1778_v3  ;;  %v410_v18 = vmul.f32 %v1796_v10, %v1796_v10  ;;  %v409_v19 = vmul.f32 %v1798_v11, %v1798_v11  ;;  %v1421_v30 = vld [vmem:[#allocation5 + $0x8] sm:$0xff]   ;;  %v1422_v34 = vld [vmem:[#allocation5 + $0x50] sm:$0xff]   ;;  %v1424_v38 = vld [vmem:[#allocation5 + $0x58] sm:$0xff]   ;;  %p1525_p4 = scmp.ne.s32.totalorder %s2056_s25, %s1524_s16  ;;  %s1528_s29 = sshll.u32 %s1600_s23, 4  ;;  %s1529_s29 = int_to_ptr.vmem [resolvable:$false] %s1528_s29 }
  0x5a   : > { %v1819_v21 = vunpack.c.h.bf16 %v1255_v20  ;;  %v1821_v22 = vunpack.c.l.bf16 %v1255_v20  ;;  %v1826_v26 = vunpack.c.h.bf16 %v1259_v23  ;;  %v1828_v27 = vunpack.c.l.bf16 %v1259_v23  ;;  %1277 = vmatprep.subr.bf16.mxu0 %v1418_v24  ;;  %1341 = vmatprep.subr.bf16.mxu1 %v1418_v24  ;;  %v1423_v37 = vld [vmem:[#allocation5 + $0x10] sm:$0xff]   ;;  %v1425_v41 = vld [vmem:[#allocation5 + $0x18] sm:$0xff]   ;;  %v1426_v42 = vld [vmem:[#allocation5 + $0x60] sm:$0xff]   ;;  %s1530_s30 = scalar_lea.vmem %s1529_s29, 2048  ;;  %p1531_p11 = scmp.lt.s32.totalorder %s2056_s25, %s1529_s29 }
  0x5b   : > { %1278 = vmatpush3.bf16.msra.mxu0 %v1419_v25  ;;  %1349 = vmatpush3.bf16.msra.mxu1 %v1419_v25  ;;  %v1833_v31 = vunpack.c.h.bf16 %v1263_v28  ;;  %v1835_v32 = vunpack.c.l.bf16 %v1263_v28  ;;  %v1840_v35 = vunpack.c.h.bf16 %v1267_v33  ;;  %v1842_v36 = vunpack.c.l.bf16 %v1267_v33  ;;  %v1427_v45 = vld [vmem:[#allocation5 + $0x20] sm:$0xff]   ;;  %v1428_v46 = vld [vmem:[#allocation5 + $0x68] sm:$0xff]   ;;  %v1430_v50 = vld [vmem:[#allocation5 + $0x70] sm:$0xff]   ;;  %p1526_p6 = pnand %p1525_p4, %p1709_p12  ;;  %p1532_p13 = scmp.lt.s32.totalorder %s1530_s30, %s1524_s16 }
  0x5c   : > { %291 = vadd.xlane.f32.xlu1 %v1782_v4  ;;  %1279 = vmatprep.subr.bf16.mxu0 %v1420_v29  ;;  %v356_v39 = vmul.f32 %v1819_v21, %v1819_v21  ;;  %v355_v40 = vmul.f32 %v1821_v22, %v1821_v22  ;;  %v364_v43 = vmul.f32 %v1826_v26, %v1826_v26  ;;  %v1429_v49 = vld [vmem:[#allocation5 + $0x28] sm:$0xff]   ;;  %v1431_v53 = vld [vmem:[#allocation5 + $0x30] sm:$0xff]   ;;  %v1256_v54 = vld [vmem:[%s1764_s11 + $0x20] sm:$0xff]  }
  0x5d   : > { %275 = vadd.xlane.f32.xlu0 %v1784_v5  ;;  %1342 = vmatprep.subr.bf16.mxu1 %v1420_v29  ;;  %v363_v44 = vmul.f32 %v1828_v27, %v1828_v27  ;;  %v404_v47 = vmul.f32 %v1833_v31, %v1833_v31  ;;  %v403_v48 = vmul.f32 %v1835_v32, %v1835_v32  ;;  %v1432_v55 = vld [vmem:[#allocation5 + $0x78] sm:$0xff]   ;;  %v1863_v56 = vunpack.c.h.bf16 %v1256_v54  ;;  %v1260_v59 = vld [vmem:[%s1764_s11 + $0x60] sm:$0xff]   ;;  %v1264_v62 = vld [vmem:[%s1764_s11 + $0x28] sm:$0xff]   ;;  %p1527_p8 = pneg %p1526_p6  ;;  %p1533_p3 = por %p1532_p13, %p1531_p11 }
  0x5e   : > { %v412_v51 = vmul.f32 %v1840_v35, %v1840_v35  ;;  %v411_v52 = vmul.f32 %v1842_v36, %v1842_v36  ;;  %v1865_v57 = vunpack.c.l.bf16 %v1256_v54  ;;  %v1433_v58 = vld [vmem:[#allocation5 + $0x38] sm:$0xff]   ;;  %v1870_v60 = vunpack.c.h.bf16 %v1260_v59  ;;  %v1268_v1 = vld [vmem:[%s1764_s11 + $0x68] sm:$0xff]   ;;  %v1257_v20 = vld [vmem:[%s1764_s11 + $0x30] sm:$0xff]  }
  0x5f   : > { %1280 = vmatpush3.bf16.msra.mxu0 %v1421_v30  ;;  %1350 = vmatpush3.bf16.msra.mxu1 %v1421_v30  ;;  %v1872_v61 = vunpack.c.l.bf16 %v1260_v59  ;;  %v1877_v63 = vunpack.c.h.bf16 %v1264_v62  ;;  %v1879_v0 = vunpack.c.l.bf16 %v1264_v62  ;;  %v1884_v6 = vunpack.c.h.bf16 %v1268_v1  ;;  %v1261_v25 = vld [vmem:[%s1764_s11 + $0x70] sm:$0xff]   ;;  %v1265_v30 = vld [vmem:[%s1764_s11 + $0x38] sm:$0xff]   ;;  %p1534_p7 = pnand %p1533_p3, %p1527_p8 }
  0x60   : > { %307 = vadd.xlane.f32.xlu1 %v1790_v8  ;;  %1281 = vmatprep.subr.bf16.mxu0 %v1422_v34  ;;  %v1886_v7 = vunpack.c.l.bf16 %v1268_v1  ;;  %v1907_v23 = vunpack.c.h.bf16 %v1257_v20  ;;  %v1909_v24 = vunpack.c.l.bf16 %v1257_v20  ;;  %v1914_v28 = vunpack.c.h.bf16 %v1261_v25 }
  0x61   : > { %305 = vadd.xlane.f32.xlu0 %v1792_v9  ;;  %1343 = vmatprep.subr.bf16.mxu1 %v1422_v34  ;;  %v1916_v29 = vunpack.c.l.bf16 %v1261_v25  ;;  %v1921_v33 = vunpack.c.h.bf16 %v1265_v30  ;;  %v1923_v34 = vunpack.c.l.bf16 %v1265_v30 }
  0x63   : > { %1282 = vmatpush3.bf16.msra.mxu0 %v1423_v37  ;;  %1351 = vmatpush3.bf16.msra.mxu1 %v1423_v37  ;;  %v1269_v37 = vld [vmem:[%s1764_s11 + $0x78] sm:$0xff]  }
  0x64   : > { %323 = vadd.xlane.f32.xlu1 %v1796_v10  ;;  %1283 = vmatprep.subr.bf16.mxu0 %v1424_v38 }
  0x65   : > { %321 = vadd.xlane.f32.xlu0 %v1798_v11  ;;  %1344 = vmatprep.subr.bf16.mxu1 %v1424_v38  ;;  %v1928_v38 = vunpack.c.h.bf16 %v1269_v37 }
  0x67   : > { %1284 = vmatpush3.bf16.msra.mxu0 %v1425_v41  ;;  %1352 = vmatpush3.bf16.msra.mxu1 %v1425_v41  ;;  %v359_v41 = vmul.f32 %v1909_v24, %v1909_v24 }
  0x68   : > { %371 = vadd.xlane.f32.xlu1 %v354_v12  ;;  %1285 = vmatprep.subr.bf16.mxu0 %v1426_v42  ;;  %v358_v12 = vmul.f32 %v1863_v56, %v1863_v56 }
  0x69   : > { %369 = vadd.xlane.f32.xlu0 %v353_v13  ;;  %1345 = vmatprep.subr.bf16.mxu1 %v1426_v42  ;;  %v357_v13 = vmul.f32 %v1865_v57, %v1865_v57  ;;  %v368_v42 = vmul.f32 %v1914_v28, %v1914_v28 }
  0x6b   : > { %1286 = vmatpush3.bf16.msra.mxu0 %v1427_v45  ;;  %1353 = vmatpush3.bf16.msra.mxu1 %v1427_v45  ;;  %v407_v45 = vmul.f32 %v1923_v34, %v1923_v34 }
  0x6c   : > { %387 = vadd.xlane.f32.xlu1 %v362_v14  ;;  %1287 = vmatprep.subr.bf16.mxu0 %v1428_v46  ;;  %v366_v14 = vmul.f32 %v1870_v60, %v1870_v60 }
  0x6d   : > { %385 = vadd.xlane.f32.xlu0 %v361_v15  ;;  %1346 = vmatprep.subr.bf16.mxu1 %v1428_v46  ;;  %v365_v15 = vmul.f32 %v1872_v61, %v1872_v61  ;;  %v416_v46 = vmul.f32 %v1928_v38, %v1928_v38 }
  0x6f   : > { %1288 = vmatpush3.bf16.msra.mxu0 %v1429_v49  ;;  %1354 = vmatpush3.bf16.msra.mxu1 %v1429_v49 }
  0x70   : > { %419 = vadd.xlane.f32.xlu1 %v402_v16  ;;  %1289 = vmatprep.subr.bf16.mxu0 %v1430_v50  ;;  %v406_v16 = vmul.f32 %v1877_v63, %v1877_v63 }
  0x71   : > { %417 = vadd.xlane.f32.xlu0 %v401_v17  ;;  %1347 = vmatprep.subr.bf16.mxu1 %v1430_v50  ;;  %v405_v17 = vmul.f32 %v1879_v0, %v1879_v0 }
  0x73   : > { %1290 = vmatpush3.bf16.msra.mxu0 %v1431_v53  ;;  %1355 = vmatpush3.bf16.msra.mxu1 %v1431_v53 }
  0x74   : > { %435 = vadd.xlane.f32.xlu1 %v410_v18  ;;  %1291 = vmatprep.subr.bf16.mxu0 %v1432_v55  ;;  %v414_v18 = vmul.f32 %v1884_v6, %v1884_v6 }
  0x75   : > { %433 = vadd.xlane.f32.xlu0 %v409_v19  ;;  %1348 = vmatprep.subr.bf16.mxu1 %v1432_v55  ;;  %v413_v19 = vmul.f32 %v1886_v7, %v1886_v7 }
  0x77   : > { %1292 = vmatpush3.bf16.msra.mxu0 %v1433_v58  ;;  %1356 = vmatpush3.bf16.msra.mxu1 %v1433_v58 }
  0x78   : > { %279 = vadd.xlane.f32.xlu1 %v1819_v21 }
  0x79   : > { %277 = vadd.xlane.f32.xlu0 %v1821_v22 }
  0x7c   : > { %295 = vadd.xlane.f32.xlu1 %v1826_v26 }
  0x7d   : > { %293 = vadd.xlane.f32.xlu0 %v1828_v27 }
  0x80   : > { %311 = vadd.xlane.f32.xlu1 %v1833_v31 }
  0x81   : > { %309 = vadd.xlane.f32.xlu0 %v1835_v32 }
  0x84   : > { %327 = vadd.xlane.f32.xlu1 %v1840_v35 }
  0x85   : > { %325 = vadd.xlane.f32.xlu0 %v1842_v36 }
  0x88   : > { %375 = vadd.xlane.f32.xlu1 %v356_v39  ;;  %v1930_v39 = vunpack.c.l.bf16 %v1269_v37 }
  0x89   : > { %373 = vadd.xlane.f32.xlu0 %v355_v40  ;;  %v360_v40 = vmul.f32 %v1907_v23, %v1907_v23 }
  0x8c   : > { %391 = vadd.xlane.f32.xlu1 %v364_v43  ;;  %v367_v43 = vmul.f32 %v1916_v29, %v1916_v29 }
  0x8d   : > { %389 = vadd.xlane.f32.xlu0 %v363_v44  ;;  %v408_v44 = vmul.f32 %v1921_v33, %v1921_v33 }
  0x90   : > { %423 = vadd.xlane.f32.xlu1 %v404_v47  ;;  %v415_v47 = vmul.f32 %v1930_v39, %v1930_v39 }
  0x91   : > { %421 = vadd.xlane.f32.xlu0 %v403_v48 }
  0x94   : > { %439 = vadd.xlane.f32.xlu1 %v412_v51 }
  0x95   : > { %437 = vadd.xlane.f32.xlu0 %v411_v52 }
  0x98   : > { %283 = vadd.xlane.f32.xlu1 %v1863_v56 }
  0x99   : > { %281 = vadd.xlane.f32.xlu0 %v1865_v57 }
  0x9c   : > { %299 = vadd.xlane.f32.xlu1 %v1870_v60 }
  0x9d   : > { %297 = vadd.xlane.f32.xlu0 %v1872_v61 }
  0xa0   : > { %315 = vadd.xlane.f32.xlu1 %v1877_v63 }
  0xa1   : > { %313 = vadd.xlane.f32.xlu0 %v1879_v0 }
  0xa4   : > { %331 = vadd.xlane.f32.xlu1 %v1884_v6 }
  0xa5   : > { %329 = vadd.xlane.f32.xlu0 %v1886_v7 }
  0xa8   : > { %379 = vadd.xlane.f32.xlu1 %v358_v12 }
  0xa9   : > { %377 = vadd.xlane.f32.xlu0 %v357_v13 }
  0xac   : > { %395 = vadd.xlane.f32.xlu1 %v366_v14 }
  0xad   : > { %393 = vadd.xlane.f32.xlu0 %v365_v15 }
  0xb0   : > { %427 = vadd.xlane.f32.xlu1 %v406_v16 }
  0xb1   : > { %425 = vadd.xlane.f32.xlu0 %v405_v17 }
  0xb4   : > { %443 = vadd.xlane.f32.xlu1 %v414_v18 }
  0xb5   : > { %441 = vadd.xlane.f32.xlu0 %v413_v19 }
  0xb8   : > { %287 = vadd.xlane.f32.xlu1 %v1907_v23 }
  0xb9   : > { %285 = vadd.xlane.f32.xlu0 %v1909_v24 }
  0xbc   : > { %303 = vadd.xlane.f32.xlu1 %v1914_v28 }
  0xbd   : > { %301 = vadd.xlane.f32.xlu0 %v1916_v29 }
  0xc0   : > { %319 = vadd.xlane.f32.xlu1 %v1921_v33 }
  0xc1   : > { %317 = vadd.xlane.f32.xlu0 %v1923_v34 }
  0xc4   : > { %335 = vadd.xlane.f32.xlu1 %v1928_v38 }
  0xc5   : > { %333 = vadd.xlane.f32.xlu0 %v1930_v39 }
  0xc8   : > { %383 = vadd.xlane.f32.xlu1 %v360_v40 }
  0xc9   : > { %381 = vadd.xlane.f32.xlu0 %v359_v41 }
  0xcc   : > { %399 = vadd.xlane.f32.xlu1 %v368_v42 }
  0xcd   : > { %397 = vadd.xlane.f32.xlu0 %v367_v43 }
  0xd0   : > { %431 = vadd.xlane.f32.xlu1 %v408_v44 }
  0xd1   : > { %429 = vadd.xlane.f32.xlu0 %v407_v45 }
  0xd4   : > { %447 = vadd.xlane.f32.xlu1 %v416_v46 }
  0xd5   : > { %445 = vadd.xlane.f32.xlu0 %v415_v47 }
  0xe5   : > { %v290_v48 = vpop.xlane.xlu1 %289 }
  0xe6   : > { %v274_v49 = vpop.xlane.xlu0 %273 }
  0xe9   : > { %v292_v50 = vpop.xlane.xlu1 %291 }
  0xea   : > { %v276_v51 = vpop.xlane.xlu0 %275 }
  0xed   : > { %v308_v52 = vpop.xlane.xlu1 %307 }
  0xee   : > { %v306_v53 = vpop.xlane.xlu0 %305  ;;  %v338_v62 = vadd.f32 %v308_v52, %v276_v51 }
  0xef   : > { %v337_v1 = vadd.f32 %v306_v53, %v274_v49 }
  0xf0   : > { %v466_v16 = vmul.f32 0.00390625, %v338_v62 }
  0xf1   : > { %v324_v54 = vpop.xlane.xlu1 %323  ;;  %v465_v17 = vmul.f32 0.00390625, %v337_v1 }
  0xf2   : > { %v322_v55 = vpop.xlane.xlu0 %321  ;;  %v346_v14 = vadd.f32 %v324_v54, %v292_v50  ;;  %v498_v41 = vmul.f32 %v466_v16, %v466_v16 }
  0xf3   : > { %v345_v15 = vadd.f32 %v322_v55, %v290_v48  ;;  %v497_v42 = vmul.f32 %v465_v17, %v465_v17 }
  0xf4   : > { %v1950_v30 = vmul.f32 0.00390625, %v346_v14 }
  0xf5   : > { %v372_v58 = vpop.xlane.xlu1 %371  ;;  %v1952_v37 = vmul.f32 0.00390625, %v345_v15 }
  0xf6   : > { %v370_v59 = vpop.xlane.xlu0 %369  ;;  %v506_v50 = vmul.f32 %v1950_v30, %v1950_v30 }
  0xf7   : > { %v505_v51 = vmul.f32 %v1952_v37, %v1952_v37 }
  0xf9   : > { %v388_v12 = vpop.xlane.xlu1 %387 }
  0xfa   : > { %v386_v13 = vpop.xlane.xlu0 %385 }
  0xfd   : > { %v420_v18 = vpop.xlane.xlu1 %419 }
  0xfe   : > { %v418_v19 = vpop.xlane.xlu0 %417  ;;  %v450_v20 = vadd.f32 %v420_v18, %v372_v58 }
  0xff   : > { %v449_v25 = vadd.f32 %v418_v19, %v370_v59 }
 0x100   : > { %v482_v40 = vmul.f32 0.00390625, %v450_v20 }
 0x101   : > { %v481_v43 = vmul.f32 0.00390625, %v449_v25  ;;  %v436_v44 = vpop.xlane.xlu1 %435 }
 0x102   : > { %v434_v45 = vpop.xlane.xlu0 %433  ;;  %v514_v46 = vsub.f32 %v482_v40, %v498_v41  ;;  %v458_v49 = vadd.f32 %v436_v44, %v388_v12 }
 0x103   : > { %v513_v47 = vsub.f32 %v481_v43, %v497_v42  ;;  %v457_v48 = vadd.f32 %v434_v45, %v386_v13  ;;  %v579_v42 = vsub.f32 %v1784_v5, %v466_v16  ;;  %v580_v45 = vsub.f32 %v1790_v8, %v466_v16 }
 0x104   : > { %v530_v52 = vmax.f32 %v514_v46, 0.0  ;;  %v490_v54 = vmul.f32 0.00390625, %v458_v49  ;;  %v578_v49 = vsub.f32 %v1792_v9, %v465_v17  ;;  %v593_v5 = vsub.f32 %v1776_v2, %v1952_v37 }
 0x105   : > { %v529_v53 = vmax.f32 %v513_v47, 0.0  ;;  %v489_v55 = vmul.f32 0.00390625, %v457_v48  ;;  %v280_v58 = vpop.xlane.xlu1 %279  ;;  %v577_v47 = vsub.f32 %v1778_v3, %v465_v17  ;;  %v594_v3 = vsub.f32 %v1798_v11, %v1952_v37 }
 0x106   : > { %v278_v59 = vpop.xlane.xlu0 %277  ;;  %v546_v62 = vadd.f32 1e-05, %v530_v52  ;;  %v522_v14 = vsub.f32 %v490_v54, %v506_v50  ;;  %v595_v54 = vsub.f32 %v1782_v4, %v1950_v30  ;;  %v596_v9 = vsub.f32 %v1796_v10, %v1950_v30 }
 0x107   : > { %v545_v1 = vadd.f32 1e-05, %v529_v53  ;;  %v521_v15 = vsub.f32 %v489_v55, %v505_v51 }
 0x108   : > { %1434 = vrsqrt.f32 %v546_v62  ;;  %v538_v18 = vmax.f32 %v522_v14, 0.0 }
 0x109   : > { %v537_v12 = vmax.f32 %v521_v15, 0.0  ;;  %1436 = vrsqrt.f32 %v545_v1  ;;  %v296_v13 = vpop.xlane.xlu1 %295 }
 0x10a   : > { %v294_v19 = vpop.xlane.xlu0 %293  ;;  %v554_v20 = vadd.f32 1e-05, %v538_v18 }
 0x10b   : > { %v553_v25 = vadd.f32 1e-05, %v537_v12 }
 0x10c   : > { %1438 = vrsqrt.f32 %v554_v20 }
 0x10d   : > { %1440 = vrsqrt.f32 %v553_v25  ;;  %v312_v40 = vpop.xlane.xlu1 %311 }
 0x10e   : > { %v310_v41 = vpop.xlane.xlu0 %309  ;;  %v340_v14 = vadd.f32 %v312_v40, %v280_v58 }
 0x10f   : > { %v339_v15 = vadd.f32 %v310_v41, %v278_v59 }
 0x111   : > { %v328_v43 = vpop.xlane.xlu1 %327  ;;  %v467_v11 = vmul.f32 0.00390625, %v339_v15 }
 0x112   : > { %v326_v44 = vpop.xlane.xlu0 %325  ;;  %v1435_v46 = vpop.eup %1434 }
 0x113   : > { %v1437_v48 = vpop.eup %1436  ;;  %v612_v50 = vmul.f32 %v1435_v46, %v580_v45  ;;  %v611_v51 = vmul.f32 %v1435_v46, %v579_v42  ;;  %v348_v46 = vadd.f32 %v328_v43, %v296_v13 }
 0x114   : > { %v610_v52 = vmul.f32 %v1437_v48, %v578_v49  ;;  %v609_v53 = vmul.f32 %v1437_v48, %v577_v47  ;;  %v347_v47 = vadd.f32 %v326_v44, %v294_v19  ;;  %v468_v49 = vmul.f32 0.00390625, %v340_v14 }
 0x115   : > { %v376_v55 = vpop.xlane.xlu1 %375  ;;  %v1970_v59 = vmul.f32 0.00390625, %v348_v46 }
 0x116   : > { %v374_v62 = vpop.xlane.xlu0 %373  ;;  %v1439_v1 = vpop.eup %1438  ;;  %v642_v8 = vpack.c.bf16 %v612_v50, %v610_v52  ;;  %v641_v16 = vpack.c.bf16 %v611_v51, %v609_v53  ;;  %v1972_v40 = vmul.f32 0.00390625, %v347_v47  ;;  %v500_v41 = vmul.f32 %v468_v49, %v468_v49 }
 0x117   : > { %v1441_v17 = vpop.eup %1440  ;;  %v628_v4 = vmul.f32 %v1439_v1, %v596_v9  ;;  %v627_v20 = vmul.f32 %v1439_v1, %v595_v54  ;;  %v499_v50 = vmul.f32 %v467_v11, %v467_v11  ;;  %v508_v54 = vmul.f32 %v1970_v59, %v1970_v59 }
 0x118   : > { %824 = vmatprep.mubr.bf16.mxu0 %v642_v8  ;;  %v626_v18 = vmul.f32 %v1441_v17, %v594_v3  ;;  %v625_v12 = vmul.f32 %v1441_v17, %v593_v5  ;;  %v507_v5 = vmul.f32 %v1972_v40, %v1972_v40  ;;  %v583_v46 = vsub.f32 %v1819_v21, %v468_v49 }
 0x119   : > { %825 = vmatmul.mubr.bf16.vlgmr.msra.gmra.mrb[0].mxu0 %v641_v16  ;;  %v392_v2 = vpop.xlane.xlu1 %391  ;;  %v584_v47 = vsub.f32 %v1833_v31, %v468_v49  ;;  %v600_v21 = vsub.f32 %v1840_v35, %v1970_v59 }
 0x11a   : > { %v390_v25 = vpop.xlane.xlu0 %389  ;;  %v650_v42 = vpack.c.bf16 %v628_v4, %v626_v18  ;;  %v649_v45 = vpack.c.bf16 %v627_v20, %v625_v12 }
 0x11c   : > { %856 = vmatprep.mubr.bf16.mxu1 %v650_v42 }
 0x11d   : > { %857 = vmatmul.mubr.bf16.vlgmr.msra.gmra.mrb[0].mxu1 %v649_v45  ;;  %v424_v10 = vpop.xlane.xlu1 %423 }
 0x11e   : > { %v422_v30 = vpop.xlane.xlu0 %421  ;;  %v452_v37 = vadd.f32 %v424_v10, %v376_v55 }
 0x11f   : > { %v451_v58 = vadd.f32 %v422_v30, %v374_v62 }
 0x120   : > { %v484_v48 = vmul.f32 0.00390625, %v452_v37 }
 0x121   : > { %v483_v51 = vmul.f32 0.00390625, %v451_v58  ;;  %v440_v52 = vpop.xlane.xlu1 %439  ;;  %v581_v58 = vsub.f32 %v1821_v22, %v467_v11  ;;  %v598_v22 = vsub.f32 %v1842_v36, %v1972_v40 }
 0x122   : > { %v438_v53 = vpop.xlane.xlu0 %437  ;;  %v516_v13 = vsub.f32 %v484_v48, %v500_v41  ;;  %v460_v43 = vadd.f32 %v440_v52, %v392_v2  ;;  %v582_v41 = vsub.f32 %v1835_v32, %v467_v11 }
 0x123   : > { %v515_v19 = vsub.f32 %v483_v51, %v499_v50  ;;  %v459_v44 = vadd.f32 %v438_v53, %v390_v25 }
 0x124   : > { %v532_v55 = vmax.f32 %v516_v13, 0.0  ;;  %v492_v1 = vmul.f32 0.00390625, %v460_v43  ;;  %v599_v13 = vsub.f32 %v1826_v26, %v1970_v59  ;;  %v597_v43 = vsub.f32 %v1828_v27, %v1972_v40 }
 0x125   : > { %v531_v62 = vmax.f32 %v515_v19, 0.0  ;;  %v491_v8 = vmul.f32 0.00390625, %v459_v44  ;;  %v284_v16 = vpop.xlane.xlu1 %283 }
 0x126   : > { %v282_v3 = vpop.xlane.xlu0 %281  ;;  %v548_v9 = vadd.f32 1e-05, %v532_v55  ;;  %v524_v14 = vsub.f32 %v492_v1, %v508_v54 }
 0x127   : > { %v547_v17 = vadd.f32 1e-05, %v531_v62  ;;  %v523_v15 = vsub.f32 %v491_v8, %v507_v5 }
 0x128   : > { %1442 = vrsqrt.f32 %v548_v9  ;;  %v540_v18 = vmax.f32 %v524_v14, 0.0 }
 0x129   : > { %v539_v4 = vmax.f32 %v523_v15, 0.0  ;;  %1444 = vrsqrt.f32 %v547_v17  ;;  %v300_v12 = vpop.xlane.xlu1 %299 }
 0x12a   : > { %v298_v20 = vpop.xlane.xlu0 %297  ;;  %v556_v2 = vadd.f32 1e-05, %v540_v18 }
 0x12b   : > { %v555_v25 = vadd.f32 1e-05, %v539_v4 }
 0x12c   : > { %1446 = vrsqrt.f32 %v556_v2 }
 0x12d   : > { %1448 = vrsqrt.f32 %v555_v25  ;;  %v316_v42 = vpop.xlane.xlu1 %315 }
 0x12e   : > { %v314_v45 = vpop.xlane.xlu0 %313  ;;  %v342_v54 = vadd.f32 %v316_v42, %v284_v16 }
 0x12f   : > { %v341_v5 = vadd.f32 %v314_v45, %v282_v3 }
 0x130   : > { %v470_v14 = vmul.f32 0.00390625, %v342_v54 }
 0x131   : > { %v332_v10 = vpop.xlane.xlu1 %331  ;;  %v469_v15 = vmul.f32 0.00390625, %v341_v5 }
 0x132   : > { %v330_v30 = vpop.xlane.xlu0 %329  ;;  %v1443_v37 = vpop.eup %1442  ;;  %v350_v17 = vadd.f32 %v332_v10, %v300_v12  ;;  %v502_v2 = vmul.f32 %v470_v14, %v470_v14 }
 0x133   : > { %v1445_v48 = vpop.eup %1444  ;;  %v616_v50 = vmul.f32 %v1443_v37, %v584_v47  ;;  %v615_v51 = vmul.f32 %v1443_v37, %v583_v46  ;;  %v349_v27 = vadd.f32 %v330_v30, %v298_v20  ;;  %v501_v42 = vmul.f32 %v469_v15, %v469_v15 }
 0x134   : > { %v614_v52 = vmul.f32 %v1445_v48, %v582_v41  ;;  %v613_v53 = vmul.f32 %v1445_v48, %v581_v58  ;;  %v1990_v18 = vmul.f32 0.00390625, %v350_v17 }
 0x135   : > { %v380_v19 = vpop.xlane.xlu1 %379  ;;  %v1992_v4 = vmul.f32 0.00390625, %v349_v27 }
 0x136   : > { %v378_v31 = vpop.xlane.xlu0 %377  ;;  %v1447_v49 = vpop.eup %1446  ;;  %v644_v32 = vpack.c.bf16 %v616_v50, %v614_v52  ;;  %v643_v11 = vpack.c.bf16 %v615_v51, %v613_v53  ;;  %v510_v37 = vmul.f32 %v1990_v18, %v1990_v18 }
 0x137   : > { %v1449_v44 = vpop.eup %1448  ;;  %v632_v26 = vmul.f32 %v1447_v49, %v600_v21  ;;  %v631_v1 = vmul.f32 %v1447_v49, %v599_v13  ;;  %v509_v58 = vmul.f32 %v1992_v4, %v1992_v4 }
 0x138   : > { %832 = vmatprep.mubr.bf16.mxu0 %v644_v32  ;;  %v630_v55 = vmul.f32 %v1449_v44, %v598_v22  ;;  %v629_v62 = vmul.f32 %v1449_v44, %v597_v43 }
 0x139   : > { %833 = vmatmul.mubr.bf16.gmra.mrb[4].mxu0 %v643_v11  ;;  %v396_v35 = vpop.xlane.xlu1 %395 }
 0x13a   : > { %v394_v59 = vpop.xlane.xlu0 %393  ;;  %v652_v8 = vpack.c.bf16 %v632_v26, %v630_v55  ;;  %v651_v9 = vpack.c.bf16 %v631_v1, %v629_v62  ;;  %v587_v55 = vsub.f32 %v1863_v56, %v470_v14  ;;  %v588_v26 = vsub.f32 %v1877_v63, %v470_v14 }
 0x13b   : > { %v604_v56 = vsub.f32 %v1884_v6, %v1990_v18 }
 0x13c   : > { %864 = vmatprep.mubr.bf16.mxu1 %v652_v8  ;;  %v586_v8 = vsub.f32 %v1879_v0, %v469_v15 }
 0x13d   : > { %865 = vmatmul.mubr.bf16.gmra.mrb[4].mxu1 %v651_v9  ;;  %v428_v36 = vpop.xlane.xlu1 %427 }
 0x13e   : > { %v426_v40 = vpop.xlane.xlu0 %425  ;;  %v454_v16 = vadd.f32 %v428_v36, %v380_v19 }
 0x13f   : > { %v453_v3 = vadd.f32 %v426_v40, %v378_v31 }
 0x140   : > { %v486_v25 = vmul.f32 0.00390625, %v454_v16  ;;  %v603_v16 = vsub.f32 %v1870_v60, %v1990_v18 }
 0x141   : > { %v485_v45 = vmul.f32 0.00390625, %v453_v3  ;;  %v444_v46 = vpop.xlane.xlu1 %443 }
 0x142   : > { %v442_v47 = vpop.xlane.xlu0 %441  ;;  %v518_v12 = vsub.f32 %v486_v25, %v502_v2  ;;  %v462_v10 = vadd.f32 %v444_v46, %v396_v35  ;;  %v601_v2 = vsub.f32 %v1872_v61, %v1992_v4 }
 0x143   : > { %v517_v20 = vsub.f32 %v485_v45, %v501_v42  ;;  %v461_v30 = vadd.f32 %v442_v47, %v394_v59  ;;  %v585_v59 = vsub.f32 %v1865_v57, %v469_v15  ;;  %v602_v57 = vsub.f32 %v1886_v7, %v1992_v4 }
 0x144   : > { %v534_v41 = vmax.f32 %v518_v12, 0.0  ;;  %v494_v50 = vmul.f32 0.00390625, %v462_v10 }
 0x145   : > { %v533_v48 = vmax.f32 %v517_v20, 0.0  ;;  %v493_v51 = vmul.f32 0.00390625, %v461_v30  ;;  %v288_v52 = vpop.xlane.xlu1 %287 }
 0x146   : > { %v286_v53 = vpop.xlane.xlu0 %285  ;;  %v550_v13 = vadd.f32 1e-05, %v534_v41  ;;  %v526_v19 = vsub.f32 %v494_v50, %v510_v37 }
 0x147   : > { %v549_v21 = vadd.f32 1e-05, %v533_v48  ;;  %v525_v31 = vsub.f32 %v493_v51, %v509_v58 }
 0x148   : > { %1450 = vrsqrt.f32 %v550_v13  ;;  %v542_v49 = vmax.f32 %v526_v19, 0.0 }
 0x149   : > { %v541_v43 = vmax.f32 %v525_v31, 0.0  ;;  %1452 = vrsqrt.f32 %v549_v21  ;;  %v304_v22 = vpop.xlane.xlu1 %303 }
 0x14a   : > { %v302_v32 = vpop.xlane.xlu0 %301  ;;  %v558_v11 = vadd.f32 1e-05, %v542_v49 }
 0x14b   : > { %v557_v44 = vadd.f32 1e-05, %v541_v43 }
 0x14c   : > { %1454 = vrsqrt.f32 %v558_v11 }
 0x14d   : > { %1456 = vrsqrt.f32 %v557_v44  ;;  %v320_v54 = vpop.xlane.xlu1 %319 }
 0x14e   : > { %v318_v5 = vpop.xlane.xlu0 %317  ;;  %v344_v42 = vadd.f32 %v320_v54, %v288_v52 }
 0x14f   : > { %v343_v45 = vadd.f32 %v318_v5, %v286_v53 }
 0x150   : > { %v472_v37 = vmul.f32 0.00390625, %v344_v42 }
 0x151   : > { %v336_v62 = vpop.xlane.xlu1 %335  ;;  %v471_v58 = vmul.f32 0.00390625, %v343_v45 }
 0x152   : > { %v334_v1 = vpop.xlane.xlu0 %333  ;;  %v1451_v35 = vpop.eup %1450  ;;  %v352_v30 = vadd.f32 %v336_v62, %v304_v22  ;;  %v504_v52 = vmul.f32 %v472_v37, %v472_v37 }
 0x153   : > { %v1453_v9 = vpop.eup %1452  ;;  %v620_v17 = vmul.f32 %v1451_v35, %v588_v26  ;;  %v619_v27 = vmul.f32 %v1451_v35, %v587_v55  ;;  %v351_v61 = vadd.f32 %v334_v1, %v302_v32  ;;  %v503_v13 = vmul.f32 %v471_v58, %v471_v58 }
 0x154   : > { %v618_v36 = vmul.f32 %v1453_v9, %v586_v8  ;;  %v617_v40 = vmul.f32 %v1453_v9, %v585_v59  ;;  %v480_v50 = vmul.f32 0.00390625, %v352_v30 }
 0x155   : > { %v384_v3 = vpop.xlane.xlu1 %383  ;;  %v479_v51 = vmul.f32 0.00390625, %v351_v61 }
 0x156   : > { %v382_v63 = vpop.xlane.xlu0 %381  ;;  %v1455_v14 = vpop.eup %1454  ;;  %v646_v0 = vpack.c.bf16 %v620_v17, %v618_v36  ;;  %v645_v15 = vpack.c.bf16 %v619_v27, %v617_v40  ;;  %v512_v11 = vmul.f32 %v480_v50, %v480_v50  ;;  %v591_v36 = vsub.f32 %v1907_v23, %v472_v37 }
 0x157   : > { %v1457_v25 = vpop.eup %1456  ;;  %v636_v60 = vmul.f32 %v1455_v14, %v604_v56  ;;  %v635_v12 = vmul.f32 %v1455_v14, %v603_v16  ;;  %v511_v44 = vmul.f32 %v479_v51, %v479_v51  ;;  %v592_v40 = vsub.f32 %v1921_v33, %v472_v37 }
 0x158   : > { %840 = vmatprep.mubr.bf16.mxu0 %v646_v0  ;;  %v634_v46 = vmul.f32 %v1457_v25, %v602_v57  ;;  %v633_v47 = vmul.f32 %v1457_v25, %v601_v2  ;;  %v589_v56 = vsub.f32 %v1909_v24, %v471_v58  ;;  %v608_v25 = vsub.f32 %v1928_v38, %v480_v50 }
 0x159   : > { %841 = vmatmul.mubr.bf16.gmra.mrb[8].mxu0 %v645_v15  ;;  %v400_v6 = vpop.xlane.xlu1 %399  ;;  %v607_v15 = vsub.f32 %v1914_v28, %v480_v50  ;;  %v605_v45 = vsub.f32 %v1916_v29, %v479_v51  ;;  %v606_v23 = vsub.f32 %v1930_v39, %v479_v51  ;;  %v2021_v39 = vld [vmem:[%s2102_s2] ss:$0 sm:$0xff] }
 0x15a   : > { %v398_v18 = vpop.xlane.xlu0 %397  ;;  %v654_v20 = vpack.c.bf16 %v636_v60, %v634_v46  ;;  %v653_v10 = vpack.c.bf16 %v635_v12, %v633_v47 }
 0x15c   : > { %872 = vmatprep.mubr.bf16.mxu1 %v654_v20 }
 0x15d   : > { %873 = vmatmul.mubr.bf16.gmra.mrb[8].mxu1 %v653_v10  ;;  %v432_v7 = vpop.xlane.xlu1 %431 }
 0x15e   : > { %v430_v4 = vpop.xlane.xlu0 %429  ;;  %v456_v41 = vadd.f32 %v432_v7, %v384_v3  ;;  %v590_v3 = vsub.f32 %v1923_v34, %v471_v58 }
 0x15f   : > { %v455_v48 = vadd.f32 %v430_v4, %v382_v63 }
 0x160   : > { %v488_v53 = vmul.f32 0.00390625, %v456_v41 }
 0x161   : > { %v487_v21 = vmul.f32 0.00390625, %v455_v48  ;;  %v448_v19 = vpop.xlane.xlu1 %447 }
 0x162   : > { %v446_v31 = vpop.xlane.xlu0 %445  ;;  %v520_v49 = vsub.f32 %v488_v53, %v504_v52  ;;  %v464_v22 = vadd.f32 %v448_v19, %v400_v6 }
 0x163   : > { %v519_v43 = vsub.f32 %v487_v21, %v503_v13  ;;  %v463_v32 = vadd.f32 %v446_v31, %v398_v18 }
 0x164   : > { %v536_v54 = vmax.f32 %v520_v49, 0.0  ;;  %v496_v55 = vmul.f32 0.00390625, %v464_v22 }
 0x165   : > { %v535_v5 = vmax.f32 %v519_v43, 0.0  ;;  %v495_v26 = vmul.f32 0.00390625, %v463_v32 }
 0x166   : > { %v552_v62 = vadd.f32 1e-05, %v536_v54  ;;  %v528_v35 = vsub.f32 %v496_v55, %v512_v11 }
 0x167   : > { %v551_v1 = vadd.f32 1e-05, %v535_v5  ;;  %v527_v59 = vsub.f32 %v495_v26, %v511_v44 }
 0x168   : > { %1458 = vrsqrt.f32 %v552_v62  ;;  %v544_v8 = vmax.f32 %v528_v35, 0.0 }
 0x169   : > { %v543_v9 = vmax.f32 %v527_v59, 0.0  ;;  %1460 = vrsqrt.f32 %v551_v1 }
 0x16a   : > { %v560_v17 = vadd.f32 1e-05, %v544_v8 }
 0x16b   : > { %v559_v27 = vadd.f32 1e-05, %v543_v9 }
 0x16c   : > { %1462 = vrsqrt.f32 %v560_v17 }
 0x16d   : > { %1464 = vrsqrt.f32 %v559_v27 }
 0x172   : > { %v1459_v16 = vpop.eup %1458 }
 0x173   : > { %v1461_v63 = vpop.eup %1460  ;;  %v624_v14 = vmul.f32 %v1459_v16, %v592_v40  ;;  %v623_v2 = vmul.f32 %v1459_v16, %v591_v36 }
 0x174   : > { %v622_v57 = vmul.f32 %v1461_v63, %v590_v3  ;;  %v621_v0 = vmul.f32 %v1461_v63, %v589_v56 }
 0x176   : > { %v1463_v42 = vpop.eup %1462  ;;  %v648_v33 = vpack.c.bf16 %v624_v14, %v622_v57  ;;  %v647_v46 = vpack.c.bf16 %v623_v2, %v621_v0 }
 0x177   : > { %v1465_v60 = vpop.eup %1464  ;;  %v640_v24 = vmul.f32 %v1463_v42, %v608_v25  ;;  %v639_v34 = vmul.f32 %v1463_v42, %v607_v15 }
 0x178   : > { %848 = vmatprep.mubr.bf16.mxu0 %v648_v33  ;;  %v638_v47 = vmul.f32 %v1465_v60, %v606_v23  ;;  %v637_v12 = vmul.f32 %v1465_v60, %v605_v45 }
 0x179   : > { %849 = vmatmul.mubr.bf16.gmra.mrb[12].mxu0 %v647_v46 }
 0x17a   : > { %v656_v6 = vpack.c.bf16 %v640_v24, %v638_v47  ;;  %v655_v18 = vpack.c.bf16 %v639_v34, %v637_v12 }
 0x17c   : > { %880 = vmatprep.mubr.bf16.mxu1 %v656_v6 }
 0x17d   : > { %881 = vmatmul.mubr.bf16.gmra.mrb[12].mxu1 %v655_v18 }
 0x1ec   : > { %v1293_v28 = vpop.f32.mrb[0].mxu0 }
 0x1ed   : > { %v1294_v38 = vpop.f32.mrb[1].mxu0 }
 0x1ee   : > { %v1295_v20 = vadd.f32 %v1294_v38, %v1293_v28  ;;  %v1296_v29 = vpop.f32.mrb[2].mxu0 }
 0x1ef   : > { %v1297_v10 = vpop.f32.mrb[3].mxu0 }
 0x1f0   : > { %v1298_v30 = vadd.f32 %v1297_v10, %v1296_v29  ;;  %v1317_v61 = vpop.f32.mrb[0].mxu1  ;;  %v827_v58 = vadd.f32 %v1295_v20, %v2021_v39 }
 0x1f1   : > { %v1318_v37 = vpop.f32.mrb[1].mxu1 }
 0x1f2   : > { %v830_v7 = vadd.f32 %v1298_v30, %v2021_v39  ;;  %v1319_v4 = vadd.f32 %v1318_v37, %v1317_v61  ;;  %v1320_v41 = vpop.f32.mrb[2].mxu1 }
 0x1f3   : > { %v1321_v48 = vpop.f32.mrb[3].mxu1 }
 0x1f4   : > { %v1218_v50 = vpack.c.bf16 %v830_v7, %v827_v58  ;;  %v1322_v51 = vadd.f32 %v1321_v48, %v1320_v41  ;;  %v859_v52 = vadd.f32 %v1319_v4, %v2021_v39 }
 0x1f6   : > { %1219 = vst [vmem:[%s2026_s9] sm:$0xff] %v1218_v50   ;;  %v862_v53 = vadd.f32 %v1322_v51, %v2021_v39 }
 0x1f8   : > { %v1238_v13 = vpack.c.bf16 %v862_v53, %v859_v52 }
 0x1fa   : > { %1273 = vst [vmem:[%s2026_s9 + $0x20] sm:$0xff] %v1238_v13  }
 0x20c   : > { %v1299_v21 = vpop.f32.mrb[4].mxu0 }
 0x20d   : > { %v1300_v19 = vpop.f32.mrb[5].mxu0 }
 0x20e   : > { %v1301_v31 = vadd.f32 %v1300_v19, %v1299_v21  ;;  %v1302_v49 = vpop.f32.mrb[6].mxu0 }
 0x20f   : > { %v1303_v43 = vpop.f32.mrb[7].mxu0 }
 0x210   : > { %v1304_v22 = vadd.f32 %v1303_v43, %v1302_v49  ;;  %v1323_v32 = vpop.f32.mrb[4].mxu1  ;;  %v835_v44 = vadd.f32 %v1301_v31, %v2021_v39 }
 0x211   : > { %v1324_v11 = vpop.f32.mrb[5].mxu1 }
 0x212   : > { %v838_v54 = vadd.f32 %v1304_v22, %v2021_v39  ;;  %v1325_v5 = vadd.f32 %v1324_v11, %v1323_v32  ;;  %v1326_v55 = vpop.f32.mrb[6].mxu1 }
 0x213   : > { %v1327_v26 = vpop.f32.mrb[7].mxu1 }
 0x214   : > { %v1223_v62 = vpack.c.bf16 %v838_v54, %v835_v44  ;;  %v1328_v1 = vadd.f32 %v1327_v26, %v1326_v55  ;;  %v867_v35 = vadd.f32 %v1325_v5, %v2021_v39 }
 0x216   : > { %1270 = vst [vmem:[%s2026_s9 + $0x8] sm:$0xff] %v1223_v62   ;;  %v870_v59 = vadd.f32 %v1328_v1, %v2021_v39 }
 0x218   : > { %v1243_v8 = vpack.c.bf16 %v870_v59, %v867_v35 }
 0x21a   : > { %1274 = vst [vmem:[%s2026_s9 + $0x28] sm:$0xff] %v1243_v8  }
 0x22c   : > { %v1305_v9 = vpop.f32.mrb[8].mxu0 }
 0x22d   : > { %v1306_v17 = vpop.f32.mrb[9].mxu0 }
 0x22e   : > { %v1307_v27 = vadd.f32 %v1306_v17, %v1305_v9  ;;  %v1308_v36 = vpop.f32.mrb[10].mxu0 }
 0x22f   : > { %v1309_v40 = vpop.f32.mrb[11].mxu0 }
 0x230   : > { %v1310_v16 = vadd.f32 %v1309_v40, %v1308_v36  ;;  %v1329_v56 = vpop.f32.mrb[8].mxu1  ;;  %v843_v63 = vadd.f32 %v1307_v27, %v2021_v39 }
 0x231   : > { %v1330_v3 = vpop.f32.mrb[9].mxu1 }
 0x232   : > { %v846_v14 = vadd.f32 %v1310_v16, %v2021_v39  ;;  %v1331_v2 = vadd.f32 %v1330_v3, %v1329_v56  ;;  %v1332_v57 = vpop.f32.mrb[10].mxu1 }
 0x233   : > { %v1333_v0 = vpop.f32.mrb[11].mxu1 }
 0x234   : > { %v1228_v15 = vpack.c.bf16 %v846_v14, %v843_v63  ;;  %v1334_v25 = vadd.f32 %v1333_v0, %v1332_v57  ;;  %v875_v42 = vadd.f32 %v1331_v2, %v2021_v39 }
 0x236   : > { %1271 = vst [vmem:[%s2026_s9 + $0x10] sm:$0xff] %v1228_v15   ;;  %v878_v45 = vadd.f32 %v1334_v25, %v2021_v39 }
 0x238   : > { %v1248_v23 = vpack.c.bf16 %v878_v45, %v875_v42 }
 0x23a   : > { %1275 = vst [vmem:[%s2026_s9 + $0x30] sm:$0xff] %v1248_v23  }
 0x24c   : > { %v1311_v33 = vpop.f32.mrb[12].mxu0 }
 0x24d   : > { %v1312_v46 = vpop.f32.mrb[13].mxu0 }
 0x24e   : > { %v1313_v60 = vadd.f32 %v1312_v46, %v1311_v33  ;;  %v1314_v24 = vpop.f32.mrb[14].mxu0 }
 0x24f   : > { %v1315_v34 = vpop.f32.mrb[15].mxu0 }
 0x250   : > { %v1316_v47 = vadd.f32 %v1315_v34, %v1314_v24  ;;  %v1335_v12 = vpop.f32.mrb[12].mxu1  ;;  %v851_v18 = vadd.f32 %v1313_v60, %v2021_v39 }
 0x251   : > { %v1336_v6 = vpop.f32.mrb[13].mxu1 }
 0x252   : > { %v854_v28 = vadd.f32 %v1316_v47, %v2021_v39  ;;  %v1337_v38 = vadd.f32 %v1336_v6, %v1335_v12  ;;  %v1338_v20 = vpop.f32.mrb[14].mxu1 }
 0x253   : > { %v1339_v29 = vpop.f32.mrb[15].mxu1 }
 0x254   : > { %v1233_v10 = vpack.c.bf16 %v854_v28, %v851_v18  ;;  %v1340_v30 = vadd.f32 %v1339_v29, %v1338_v20  ;;  %v883_v61 = vadd.f32 %v1337_v38, %v2021_v39 }
 0x256   : > { %1272 = vst [vmem:[%s2026_s9 + $0x18] sm:$0xff] %v1233_v10   ;;  %v886_v37 = vadd.f32 %v1340_v30, %v2021_v39 }
 0x258   : > { %v1253_v58 = vpack.c.bf16 %v886_v37, %v883_v61 }
 0x25a   : > { %1276 = vst [vmem:[%s2026_s9 + $0x38] sm:$0xff] %v1253_v58  }
 0x25b   : > { %1537 = shalt.err (!%p1534_p7)
}
 0x25c   : > { %s1538_s22 = scalar_lea.hbm %s2054_s27, 1024  ;;  %s1542_s11 = scalar_lea.hbm %s2103_s3, 4096 }
 0x25d   : > { %p1539_p9 = scmp.ne.s32.totalorder %s2054_s27, %s1538_s22  ;;  %p1543_p5 = scmp.lt.u32.totalorder %s2054_s27, %s2103_s3 }
 0x25e   : > { %p1544_p10 = scmp.lt.u32.totalorder %s1542_s11, %s1538_s22  ;;  %p1546_p4 = scmp.lt.u32.totalorder %s1538_s22, %s2054_s27 }
 0x25f   : > { %p1540_p1 = pnand %p1539_p9, %p1709_p12 }
 0x260   : > { %p1545_p2 = por %p1544_p10, %p1543_p5 }
 0x261   : > { %p1541_p0 = pneg %p1540_p1 }
 0x262   : > { %p1547_p6 = por %p1546_p4, %p1545_p2 }
 0x264   : > { %p1548_p8 = pnand %p1547_p6, %p1541_p0 }
 0x266   : > { %1551 = shalt.err (!%p1548_p8)
}
 0x267   : > { %s1601_s8 = smov 64   ;;  %s1602_s9 = smov 4  }
 0x268   : > { %1363 = dma.vmem_to_hbm [thread:$0]  (%p1709_p12), %s2056_s25, 1024, %s2054_s27, %s970_s28, %s1601_s8, %s1601_s8, %s1602_s9  }
 0x269 PF: > { %p1380_p11 = scmp.ge.s32.totalorder %s1594_s15, 2  ;;  %s998_s4 = sand.u32 1, %s1582_s12  }
 0x26a   : > { %p2118_p13 = scmp.ne.s32.totalorder %s2108_s19, 0  ;;  %s999_s26 = scalar_lea.sflag [#allocation4], %s998_s4 }
 0x26c   : > { %p1374_p3 = pnand %p1380_p11, %p2118_p13 }
 0x26e   : > { %1577 = dma.done.wait (!%p1374_p3), %s999_s26, 1024  }
 0x26f   : > { %1579 = vsyncadd (!%p1374_p3), %s999_s26, 4294966272  ;;  %p17_p7 = scmp.ge.s32.totalorder %s1676_s24, 6   ;;  %s2119_s12 = smov %s1586_s13 }
 0x270   : > { %s2120_s13 = smov %s1590_s14  ;;  %s2121_s14 = smov %s1705_s17 }
 0x271   : > { %s2122_s15 = smov %s1676_s24  ;;  %19 = sbr.rel (!%p17_p7) target bundleno = 6 (0x6), region = 82 }
 0x278   :  { %1004 = vsyncpa [#allocation3], 1 }
 0x279   :  { %1006 = vsyncpa [#allocation3 + $0x1], 1 }
 0x27a   :  { %1007 = vsyncpa [#allocation6], 1 }
 0x27b   :  { %1008 = vsyncpa [#allocation4], 1 }
 0x27c   :  { %1010 = vsyncpa [#allocation4 + $0x1], 1 }

</bundles_post_ra>
